<compile_context>
chip_gen: v7x
topology: tpu7x:2x2x1
jax: 0.10.0
libtpu: 0.0.40
codegen_flags: <defaults>
</compile_context>

<pallas_src>
import jax
import jax.numpy as jnp
import numpy as np
from jax import lax
from jax.experimental import pallas as pl
from jax.experimental.pallas import tpu as pltpu


# ------------------------------ fused Pallas kernel ------------------------------

def _lenet5_kernel(x_ref, w1b_ref, p24_ref, pw1_ref, w2b_ref, p8_ref, pw2_ref,
                   wf1_ref, wf2_ref, wf3_ref, o_ref):
    """One image per grid step; every intermediate stays on-chip."""
    f32 = jnp.float32
    bf16 = jnp.bfloat16

    x = x_ref[0]                                                   # (28, 28) f32

    # ---- conv1 (1 -> 16, 5x5, bias-free) + ReLU as 5 banded matmuls ----------
    # layout: rows = output row i (24), cols = (output col j, out-ch o) = 384
    acc1 = jnp.zeros((24, 24 * 16), f32)
    for di in range(5):
        acc1 += jnp.dot(x[di:di + 24, :].astype(bf16), w1b_ref[di],
                        preferred_element_type=f32)
    y1 = jnp.maximum(acc1, 0.0).astype(bf16)                        # (24, 384)

    # ---- AvgPool2d(2): height pool (left matmul) then width pool (right) ----
    ph = jnp.dot(p24_ref[...], y1, preferred_element_type=f32)      # (12, 384)
    t1 = jnp.dot(ph.astype(bf16), pw1_ref[...],
                 preferred_element_type=f32)                        # (12, 192) = (i, (j, c16))

    # ---- conv2 (16 -> 32, 5x5, bias-free) + ReLU as 5 banded matmuls ---------
    acc2 = jnp.zeros((8, 8 * 32), f32)
    for di in range(5):
        acc2 += jnp.dot(t1[di:di + 8, :].astype(bf16), w2b_ref[di],
                        preferred_element_type=f32)
    y2 = jnp.maximum(acc2, 0.0).astype(bf16)                        # (8, 256)

    # TODO(synk): nn.Dropout(0.25) is identity in eval mode; training-mode mask not applied.

    # ---- AvgPool2d(2) again ---------------------------------------------------
    ph2 = jnp.dot(p8_ref[...], y2, preferred_element_type=f32)      # (4, 256)
    t2 = jnp.dot(ph2.astype(bf16), pw2_ref[...],
                 preferred_element_type=f32)                        # (4, 128) = (h, (w, c32))

    # ---- fc1 (512 -> 256) + ReLU ----------------------------------------------
    # PyTorch's (C, H, W) flatten order is absorbed into the pre-permuted
    # wf1 (4, 128, 256); contract over (h, w*32 + c) without any activation
    # transpose/reshape.
    h1 = jnp.zeros((1, 256), f32)
    for h in range(4):
        h1 += jnp.dot(t2[h:h + 1, :].astype(bf16), wf1_ref[h],
                      preferred_element_type=f32)
    h1 = jnp.maximum(h1, 0.0).astype(bf16)                          # (1, 256)

    # ---- fc2 (256 -> 64) + ReLU, fc3 (64 -> 10), LogSoftmax(-1) ---------------
    h2 = jnp.maximum(jnp.dot(h1, wf2_ref[...], preferred_element_type=f32), 0.0)
    logits = jnp.dot(h2.astype(bf16), wf3_ref[...], preferred_element_type=f32)
    m = jnp.max(logits, axis=-1, keepdims=True)
    lse = jnp.log(jnp.sum(jnp.exp(logits - m), axis=-1, keepdims=True)) + m
    o_ref[0] = logits - lse                                         # (1, 10)


# ------------------------------ wrapper / weight prep ------------------------------

def lenet5_forward(x_nchw, prepped):
    """Fused LeNet5 forward (inference semantics). x_nchw: (N, 1, 28, 28) f32."""
    w1b, p24, pw1, w2b, p8, pw2, wf1, wf2, wf3 = prepped
    N = x_nchw.shape[0]
    assert x_nchw.shape[1:] == (1, 28, 28)
    # C == 1 so NCHW -> (N, 28, 28) is a pure metadata squeeze (no relayout).
    x = x_nchw.reshape(N, 28, 28).astype(jnp.float32)

    def full(a):
        return pl.BlockSpec(a.shape, lambda n, _nd=a.ndim: (0,) * _nd)

    out = pl.pallas_call(
        _lenet5_kernel,
        out_shape=jax.ShapeDtypeStruct((N, 1, 10), jnp.float32),
        grid=(N,),
        in_specs=[pl.BlockSpec((1, 28, 28), lambda n: (n, 0, 0)),
                  full(w1b), full(p24), full(pw1), full(w2b),
                  full(p8), full(pw2), full(wf1), full(wf2), full(wf3)],
        out_specs=pl.BlockSpec((1, 1, 10), lambda n: (n, 0, 0)),
        compiler_params=pltpu.CompilerParams(
            dimension_semantics=("parallel",)),   # shard batch across TCs (v7x)
    )(x, w1b, p24, pw1, w2b, p8, pw2, wf1, wf2, wf3)
    return out.reshape(N, 10)


def prepare_params(params):
    """One-time host-side weight prep (hoisted out of the forward pass).

    Returns bf16 arrays:
      w1b (5, 28, 384)   banded conv1 matrices   rows: input col, cols: (out col, out ch)
      p24 (12, 24)       height 2x avg-pool matrix (0.5 entries)
      pw1 (384, 192)     width  2x avg-pool matrix for 16-channel blocks
      w2b (5, 192, 256)  banded conv2 matrices
      p8  (4, 8)         height 2x avg-pool matrix
      pw2 (256, 128)     width  2x avg-pool matrix for 32-channel blocks
      wf1 (4, 128, 256)  fc1 weight, rows permuted from PyTorch (C,H,W) flatten
                         order to the kernel's (H, (W, C)) activation layout
      wf2 (256, 64)      fc2.T
      wf3 (64, 10)       fc3.T
    """
    w_conv1, w_conv2, w_fc1, w_fc2, w_fc3 = (np.asarray(p, np.float32) for p in params)

    # conv1: W1b[di][jin, j*16 + o] = w_conv1[o, 0, di, jin - j]  (0 <= jin-j < 5)
    w1b = np.zeros((5, 28, 24 * 16), np.float32)
    for di in range(5):
        for j in range(24):
            for dj in range(5):
                w1b[di, j + dj, j * 16:(j + 1) * 16] = w_conv1[:, 0, di, dj]

    # conv2: W2b[di][jin*16 + ci, j*32 + oc] = w_conv2[oc, ci, di, jin - j]
    w2b = np.zeros((5, 192, 8 * 32), np.float32)
    for di in range(5):
        for j in range(8):
            for dj in range(5):
                w2b[di, (j + dj) * 16:(j + dj + 1) * 16, j * 32:(j + 1) * 32] = \
                    w_conv2[:, :, di, dj].T

    def hpool(ho):
        m = np.zeros((ho, 2 * ho), np.float32)
        m[np.arange(ho), 2 * np.arange(ho)] = 0.5
        m[np.arange(ho), 2 * np.arange(ho) + 1] = 0.5
        return m

    def wpool(wo, c):
        m = np.zeros((2 * wo * c, wo * c), np.float32)
        for j in range(2 * wo):
            for ch in range(c):
                m[j * c + ch, (j // 2) * c + ch] = 0.5
        return m

    p24, pw1 = hpool(12), wpool(12, 16)
    p8, pw2 = hpool(4), wpool(4, 32)

    # fc1: wf1[h, w*32 + c, u] = w_fc1[u, c*16 + h*4 + w]
    wf1 = np.transpose(w_fc1.reshape(256, 32, 4, 4), (2, 3, 1, 0)).reshape(4, 128, 256)
    wf2 = w_fc2.T
    wf3 = w_fc3.T

    return tuple(jnp.asarray(a, jnp.bfloat16)
                 for a in (w1b, p24, pw1, w2b, p8, pw2, wf1, wf2, wf3))


def init_params(key):
    """PyTorch-layout LeNet5 weights (all layers bias-free, like the spec)."""
    k1, k2, k3, k4, k5 = jax.random.split(key, 5)
    scale = 0.05
    w_conv1 = scale * jax.random.normal(k1, (16, 1, 5, 5), jnp.float32)    # OIHW
    w_conv2 = scale * jax.random.normal(k2, (32, 16, 5, 5), jnp.float32)   # OIHW
    w_fc1 = scale * jax.random.normal(k3, (256, 512), jnp.float32)         # (out, in)
    w_fc2 = scale * jax.random.normal(k4, (64, 256), jnp.float32)
    w_fc3 = scale * jax.random.normal(k5, (10, 64), jnp.float32)
    return (w_conv1, w_conv2, w_fc1, w_fc2, w_fc3)


# ------------------------------ pure-JAX reference ------------------------------

def _avgpool2x2_ref(y):  # NCHW
    n, c, h, w = y.shape
    return y.reshape(n, c, h // 2, 2, w // 2, 2).mean(axis=(3, 5))


def lenet5_reference(x_nchw, params):
    w1, w2, wf1, wf2, wf3 = params
    dn = ("NCHW", "OIHW", "NCHW")
    y = lax.conv_general_dilated(x_nchw, w1, (1, 1), "VALID", dimension_numbers=dn)
    y = _avgpool2x2_ref(jnp.maximum(y, 0.0))
    y = lax.conv_general_dilated(y, w2, (1, 1), "VALID", dimension_numbers=dn)
    y = _avgpool2x2_ref(jnp.maximum(y, 0.0))
    flat = y.reshape(y.shape[0], -1)
    h = jnp.maximum(flat @ wf1.T, 0.0)
    h = jnp.maximum(h @ wf2.T, 0.0)
    return jax.nn.log_softmax(h @ wf3.T, axis=-1)


# ------------------------------------ main ------------------------------------

if __name__ == "__main__":
    key = jax.random.PRNGKey(0)
    key_x, key_p = jax.random.split(key)
    # fc1(512, ...) implies 28x28 single-channel inputs (MNIST-like); batch = 2.
    x = jax.random.normal(key_x, (2, 1, 28, 28), jnp.float32)   # NCHW like PyTorch
    params = init_params(key_p)
    prepped = prepare_params(params)                            # one-time weight prep

    out = jax.jit(lenet5_forward)(x, prepped)
    out = jax.block_until_ready(out)

    assert out.shape == (2, 10)
    # log-softmax rows exponentiate-sum to 1
    assert bool(jnp.all(jnp.abs(jnp.sum(jnp.exp(out), axis=-1) - 1.0) < 1e-3))
    # matches the f32 JAX reference to (generous) bf16 tolerance
    ref = lenet5_reference(x, params)
    assert bool(jnp.max(jnp.abs(out - ref)) < 2e-2)
    print("KERNEL_OK")
</pallas_src>

<mosaic_0001>
module attributes {stable_mosaic.version = 11 : i64} {
  func.func @_lenet5_kernel(%arg0: i32, %arg1: memref<1x28x28xf32, #tpu.memory_space<vmem>>, %arg2: memref<5x28x384xbf16, #tpu.memory_space<vmem>>, %arg3: memref<12x24xbf16, #tpu.memory_space<vmem>>, %arg4: memref<384x192xbf16, #tpu.memory_space<vmem>>, %arg5: memref<5x192x256xbf16, #tpu.memory_space<vmem>>, %arg6: memref<4x8xbf16, #tpu.memory_space<vmem>>, %arg7: memref<256x128xbf16, #tpu.memory_space<vmem>>, %arg8: memref<4x128x256xbf16, #tpu.memory_space<vmem>>, %arg9: memref<256x64xbf16, #tpu.memory_space<vmem>>, %arg10: memref<64x10xbf16, #tpu.memory_space<vmem>>, %arg11: memref<1x1x10xf32, #tpu.memory_space<vmem>>) attributes {dimension_semantics = [#tpu.dimension_semantics<parallel>], iteration_bounds = array<i64: 2>, scalar_prefetch = 0 : i64, scratch_operands = 0 : i64, tpu.core_type = #tpu.core_type<tc>, window_params = [{transform_indices = @transform_0, window_bounds = array<i64: 1, 28, 28>}, {pipeline_mode = #tpu.pipeline_mode<synchronous>, transform_indices = @transform_1, window_bounds = array<i64: 5, 28, 384>}, {pipeline_mode = #tpu.pipeline_mode<synchronous>, transform_indices = @transform_2, window_bounds = array<i64: 12, 24>}, {pipeline_mode = #tpu.pipeline_mode<synchronous>, transform_indices = @transform_3, window_bounds = array<i64: 384, 192>}, {pipeline_mode = #tpu.pipeline_mode<synchronous>, transform_indices = @transform_4, window_bounds = array<i64: 5, 192, 256>}, {pipeline_mode = #tpu.pipeline_mode<synchronous>, transform_indices = @transform_5, window_bounds = array<i64: 4, 8>}, {pipeline_mode = #tpu.pipeline_mode<synchronous>, transform_indices = @transform_6, window_bounds = array<i64: 256, 128>}, {pipeline_mode = #tpu.pipeline_mode<synchronous>, transform_indices = @transform_7, window_bounds = array<i64: 4, 128, 256>}, {pipeline_mode = #tpu.pipeline_mode<synchronous>, transform_indices = @transform_8, window_bounds = array<i64: 256, 64>}, {pipeline_mode = #tpu.pipeline_mode<synchronous>, transform_indices = @transform_9, window_bounds = array<i64: 64, 10>}, {transform_indices = @transform_10, window_bounds = array<i64: 1, 1, 10>}]} {
    %c0 = arith.constant 0 : index
    %c0_0 = arith.constant 0 : index
    %c0_1 = arith.constant 0 : index
    %0 = vector.load %arg1[%c0, %c0_0, %c0_1] : memref<1x28x28xf32, #tpu.memory_space<vmem>>, vector<1x28x28xf32>
    %1 = vector.shape_cast %0 : vector<1x28x28xf32> to vector<28x28xf32>
    %cst = arith.constant 0.000000e+00 : f32
    %2 = vector.broadcast %cst : f32 to vector<24x384xf32>
    %3 = vector.extract_strided_slice %1 {offsets = [0, 0], sizes = [24, 28], strides = [1, 1]} : vector<28x28xf32> to vector<24x28xf32>
    %4 = arith.truncf %3 : vector<24x28xf32> to vector<24x28xbf16>
    %c0_2 = arith.constant 0 : index
    %c0_3 = arith.constant 0 : index
    %c0_4 = arith.constant 0 : index
    %5 = vector.load %arg2[%c0_2, %c0_3, %c0_4] : memref<5x28x384xbf16, #tpu.memory_space<vmem>>, vector<1x28x384xbf16>
    %6 = vector.shape_cast %5 : vector<1x28x384xbf16> to vector<28x384xbf16>
    %cst_5 = arith.constant dense<0.000000e+00> : vector<24x384xf32>
    %7 = tpu.matmul %4, %6, %cst_5 {dimension_numbers = #tpu.dot_dimension_numbers<[1], [0], [0], [1], [0, 0, 1, 1], [], []>} : vector<24x28xbf16>, vector<28x384xbf16>, vector<24x384xf32> -> vector<24x384xf32>
    %8 = arith.addf %2, %7 : vector<24x384xf32>
    %9 = vector.extract_strided_slice %1 {offsets = [1, 0], sizes = [24, 28], strides = [1, 1]} : vector<28x28xf32> to vector<24x28xf32>
    %10 = arith.truncf %9 : vector<24x28xf32> to vector<24x28xbf16>
    %c1 = arith.constant 1 : index
    %c0_6 = arith.constant 0 : index
    %c0_7 = arith.constant 0 : index
    %11 = vector.load %arg2[%c1, %c0_6, %c0_7] : memref<5x28x384xbf16, #tpu.memory_space<vmem>>, vector<1x28x384xbf16>
    %12 = vector.shape_cast %11 : vector<1x28x384xbf16> to vector<28x384xbf16>
    %cst_8 = arith.constant dense<0.000000e+00> : vector<24x384xf32>
    %13 = tpu.matmul %10, %12, %cst_8 {dimension_numbers = #tpu.dot_dimension_numbers<[1], [0], [0], [1], [0, 0, 1, 1], [], []>} : vector<24x28xbf16>, vector<28x384xbf16>, vector<24x384xf32> -> vector<24x384xf32>
    %14 = arith.addf %8, %13 : vector<24x384xf32>
    %15 = vector.extract_strided_slice %1 {offsets = [2, 0], sizes = [24, 28], strides = [1, 1]} : vector<28x28xf32> to vector<24x28xf32>
    %16 = arith.truncf %15 : vector<24x28xf32> to vector<24x28xbf16>
    %c2 = arith.constant 2 : index
    %c0_9 = arith.constant 0 : index
    %c0_10 = arith.constant 0 : index
    %17 = vector.load %arg2[%c2, %c0_9, %c0_10] : memref<5x28x384xbf16, #tpu.memory_space<vmem>>, vector<1x28x384xbf16>
    %18 = vector.shape_cast %17 : vector<1x28x384xbf16> to vector<28x384xbf16>
    %cst_11 = arith.constant dense<0.000000e+00> : vector<24x384xf32>
    %19 = tpu.matmul %16, %18, %cst_11 {dimension_numbers = #tpu.dot_dimension_numbers<[1], [0], [0], [1], [0, 0, 1, 1], [], []>} : vector<24x28xbf16>, vector<28x384xbf16>, vector<24x384xf32> -> vector<24x384xf32>
    %20 = arith.addf %14, %19 : vector<24x384xf32>
    %21 = vector.extract_strided_slice %1 {offsets = [3, 0], sizes = [24, 28], strides = [1, 1]} : vector<28x28xf32> to vector<24x28xf32>
    %22 = arith.truncf %21 : vector<24x28xf32> to vector<24x28xbf16>
    %c3 = arith.constant 3 : index
    %c0_12 = arith.constant 0 : index
    %c0_13 = arith.constant 0 : index
    %23 = vector.load %arg2[%c3, %c0_12, %c0_13] : memref<5x28x384xbf16, #tpu.memory_space<vmem>>, vector<1x28x384xbf16>
    %24 = vector.shape_cast %23 : vector<1x28x384xbf16> to vector<28x384xbf16>
    %cst_14 = arith.constant dense<0.000000e+00> : vector<24x384xf32>
    %25 = tpu.matmul %22, %24, %cst_14 {dimension_numbers = #tpu.dot_dimension_numbers<[1], [0], [0], [1], [0, 0, 1, 1], [], []>} : vector<24x28xbf16>, vector<28x384xbf16>, vector<24x384xf32> -> vector<24x384xf32>
    %26 = arith.addf %20, %25 : vector<24x384xf32>
    %27 = vector.extract_strided_slice %1 {offsets = [4, 0], sizes = [24, 28], strides = [1, 1]} : vector<28x28xf32> to vector<24x28xf32>
    %28 = arith.truncf %27 : vector<24x28xf32> to vector<24x28xbf16>
    %c4 = arith.constant 4 : index
    %c0_15 = arith.constant 0 : index
    %c0_16 = arith.constant 0 : index
    %29 = vector.load %arg2[%c4, %c0_15, %c0_16] : memref<5x28x384xbf16, #tpu.memory_space<vmem>>, vector<1x28x384xbf16>
    %30 = vector.shape_cast %29 : vector<1x28x384xbf16> to vector<28x384xbf16>
    %cst_17 = arith.constant dense<0.000000e+00> : vector<24x384xf32>
    %31 = tpu.matmul %28, %30, %cst_17 {dimension_numbers = #tpu.dot_dimension_numbers<[1], [0], [0], [1], [0, 0, 1, 1], [], []>} : vector<24x28xbf16>, vector<28x384xbf16>, vector<24x384xf32> -> vector<24x384xf32>
    %32 = arith.addf %26, %31 : vector<24x384xf32>
    %cst_18 = arith.constant 0.000000e+00 : f32
    %33 = vector.broadcast %cst_18 : f32 to vector<24x384xf32>
    %34 = arith.maximumf %32, %33 : vector<24x384xf32>
    %35 = arith.truncf %34 : vector<24x384xf32> to vector<24x384xbf16>
    %c0_19 = arith.constant 0 : index
    %c0_20 = arith.constant 0 : index
    %36 = vector.load %arg3[%c0_19, %c0_20] : memref<12x24xbf16, #tpu.memory_space<vmem>>, vector<12x24xbf16>
    %cst_21 = arith.constant dense<0.000000e+00> : vector<12x384xf32>
    %37 = tpu.matmul %36, %35, %cst_21 {dimension_numbers = #tpu.dot_dimension_numbers<[1], [0], [0], [1], [0, 0, 1, 1], [], []>} : vector<12x24xbf16>, vector<24x384xbf16>, vector<12x384xf32> -> vector<12x384xf32>
    %38 = arith.truncf %37 : vector<12x384xf32> to vector<12x384xbf16>
    %c0_22 = arith.constant 0 : index
    %c0_23 = arith.constant 0 : index
    %39 = vector.load %arg4[%c0_22, %c0_23] : memref<384x192xbf16, #tpu.memory_space<vmem>>, vector<384x192xbf16>
    %cst_24 = arith.constant dense<0.000000e+00> : vector<12x192xf32>
    %40 = tpu.matmul %38, %39, %cst_24 {dimension_numbers = #tpu.dot_dimension_numbers<[1], [0], [0], [1], [0, 0, 1, 1], [], []>} : vector<12x384xbf16>, vector<384x192xbf16>, vector<12x192xf32> -> vector<12x192xf32>
    %cst_25 = arith.constant 0.000000e+00 : f32
    %41 = vector.broadcast %cst_25 : f32 to vector<8x256xf32>
    %42 = vector.extract_strided_slice %40 {offsets = [0, 0], sizes = [8, 192], strides = [1, 1]} : vector<12x192xf32> to vector<8x192xf32>
    %43 = arith.truncf %42 : vector<8x192xf32> to vector<8x192xbf16>
    %c0_26 = arith.constant 0 : index
    %c0_27 = arith.constant 0 : index
    %c0_28 = arith.constant 0 : index
    %44 = vector.load %arg5[%c0_26, %c0_27, %c0_28] : memref<5x192x256xbf16, #tpu.memory_space<vmem>>, vector<1x192x256xbf16>
    %45 = vector.shape_cast %44 : vector<1x192x256xbf16> to vector<192x256xbf16>
    %cst_29 = arith.constant dense<0.000000e+00> : vector<8x256xf32>
    %46 = tpu.matmul %43, %45, %cst_29 {dimension_numbers = #tpu.dot_dimension_numbers<[1], [0], [0], [1], [0, 0, 1, 1], [], []>} : vector<8x192xbf16>, vector<192x256xbf16>, vector<8x256xf32> -> vector<8x256xf32>
    %47 = arith.addf %41, %46 : vector<8x256xf32>
    %48 = vector.extract_strided_slice %40 {offsets = [1, 0], sizes = [8, 192], strides = [1, 1]} : vector<12x192xf32> to vector<8x192xf32>
    %49 = arith.truncf %48 : vector<8x192xf32> to vector<8x192xbf16>
    %c1_30 = arith.constant 1 : index
    %c0_31 = arith.constant 0 : index
    %c0_32 = arith.constant 0 : index
    %50 = vector.load %arg5[%c1_30, %c0_31, %c0_32] : memref<5x192x256xbf16, #tpu.memory_space<vmem>>, vector<1x192x256xbf16>
    %51 = vector.shape_cast %50 : vector<1x192x256xbf16> to vector<192x256xbf16>
    %cst_33 = arith.constant dense<0.000000e+00> : vector<8x256xf32>
    %52 = tpu.matmul %49, %51, %cst_33 {dimension_numbers = #tpu.dot_dimension_numbers<[1], [0], [0], [1], [0, 0, 1, 1], [], []>} : vector<8x192xbf16>, vector<192x256xbf16>, vector<8x256xf32> -> vector<8x256xf32>
    %53 = arith.addf %47, %52 : vector<8x256xf32>
    %54 = vector.extract_strided_slice %40 {offsets = [2, 0], sizes = [8, 192], strides = [1, 1]} : vector<12x192xf32> to vector<8x192xf32>
    %55 = arith.truncf %54 : vector<8x192xf32> to vector<8x192xbf16>
    %c2_34 = arith.constant 2 : index
    %c0_35 = arith.constant 0 : index
    %c0_36 = arith.constant 0 : index
    %56 = vector.load %arg5[%c2_34, %c0_35, %c0_36] : memref<5x192x256xbf16, #tpu.memory_space<vmem>>, vector<1x192x256xbf16>
    %57 = vector.shape_cast %56 : vector<1x192x256xbf16> to vector<192x256xbf16>
    %cst_37 = arith.constant dense<0.000000e+00> : vector<8x256xf32>
    %58 = tpu.matmul %55, %57, %cst_37 {dimension_numbers = #tpu.dot_dimension_numbers<[1], [0], [0], [1], [0, 0, 1, 1], [], []>} : vector<8x192xbf16>, vector<192x256xbf16>, vector<8x256xf32> -> vector<8x256xf32>
    %59 = arith.addf %53, %58 : vector<8x256xf32>
    %60 = vector.extract_strided_slice %40 {offsets = [3, 0], sizes = [8, 192], strides = [1, 1]} : vector<12x192xf32> to vector<8x192xf32>
    %61 = arith.truncf %60 : vector<8x192xf32> to vector<8x192xbf16>
    %c3_38 = arith.constant 3 : index
    %c0_39 = arith.constant 0 : index
    %c0_40 = arith.constant 0 : index
    %62 = vector.load %arg5[%c3_38, %c0_39, %c0_40] : memref<5x192x256xbf16, #tpu.memory_space<vmem>>, vector<1x192x256xbf16>
    %63 = vector.shape_cast %62 : vector<1x192x256xbf16> to vector<192x256xbf16>
    %cst_41 = arith.constant dense<0.000000e+00> : vector<8x256xf32>
    %64 = tpu.matmul %61, %63, %cst_41 {dimension_numbers = #tpu.dot_dimension_numbers<[1], [0], [0], [1], [0, 0, 1, 1], [], []>} : vector<8x192xbf16>, vector<192x256xbf16>, vector<8x256xf32> -> vector<8x256xf32>
    %65 = arith.addf %59, %64 : vector<8x256xf32>
    %66 = vector.extract_strided_slice %40 {offsets = [4, 0], sizes = [8, 192], strides = [1, 1]} : vector<12x192xf32> to vector<8x192xf32>
    %67 = arith.truncf %66 : vector<8x192xf32> to vector<8x192xbf16>
    %c4_42 = arith.constant 4 : index
    %c0_43 = arith.constant 0 : index
    %c0_44 = arith.constant 0 : index
    %68 = vector.load %arg5[%c4_42, %c0_43, %c0_44] : memref<5x192x256xbf16, #tpu.memory_space<vmem>>, vector<1x192x256xbf16>
    %69 = vector.shape_cast %68 : vector<1x192x256xbf16> to vector<192x256xbf16>
    %cst_45 = arith.constant dense<0.000000e+00> : vector<8x256xf32>
    %70 = tpu.matmul %67, %69, %cst_45 {dimension_numbers = #tpu.dot_dimension_numbers<[1], [0], [0], [1], [0, 0, 1, 1], [], []>} : vector<8x192xbf16>, vector<192x256xbf16>, vector<8x256xf32> -> vector<8x256xf32>
    %71 = arith.addf %65, %70 : vector<8x256xf32>
    %cst_46 = arith.constant 0.000000e+00 : f32
    %72 = vector.broadcast %cst_46 : f32 to vector<8x256xf32>
    %73 = arith.maximumf %71, %72 : vector<8x256xf32>
    %74 = arith.truncf %73 : vector<8x256xf32> to vector<8x256xbf16>
    %c0_47 = arith.constant 0 : index
    %c0_48 = arith.constant 0 : index
    %75 = vector.load %arg6[%c0_47, %c0_48] : memref<4x8xbf16, #tpu.memory_space<vmem>>, vector<4x8xbf16>
    %cst_49 = arith.constant dense<0.000000e+00> : vector<4x256xf32>
    %76 = tpu.matmul %75, %74, %cst_49 {dimension_numbers = #tpu.dot_dimension_numbers<[1], [0], [0], [1], [0, 0, 1, 1], [], []>} : vector<4x8xbf16>, vector<8x256xbf16>, vector<4x256xf32> -> vector<4x256xf32>
    %77 = arith.truncf %76 : vector<4x256xf32> to vector<4x256xbf16>
    %c0_50 = arith.constant 0 : index
    %c0_51 = arith.constant 0 : index
    %78 = vector.load %arg7[%c0_50, %c0_51] : memref<256x128xbf16, #tpu.memory_space<vmem>>, vector<256x128xbf16>
    %cst_52 = arith.constant dense<0.000000e+00> : vector<4x128xf32>
    %79 = tpu.matmul %77, %78, %cst_52 {dimension_numbers = #tpu.dot_dimension_numbers<[1], [0], [0], [1], [0, 0, 1, 1], [], []>} : vector<4x256xbf16>, vector<256x128xbf16>, vector<4x128xf32> -> vector<4x128xf32>
    %cst_53 = arith.constant 0.000000e+00 : f32
    %80 = vector.broadcast %cst_53 : f32 to vector<1x256xf32>
    %81 = vector.extract_strided_slice %79 {offsets = [0, 0], sizes = [1, 128], strides = [1, 1]} : vector<4x128xf32> to vector<1x128xf32>
    %82 = arith.truncf %81 : vector<1x128xf32> to vector<1x128xbf16>
    %c0_54 = arith.constant 0 : index
    %c0_55 = arith.constant 0 : index
    %c0_56 = arith.constant 0 : index
    %83 = vector.load %arg8[%c0_54, %c0_55, %c0_56] : memref<4x128x256xbf16, #tpu.memory_space<vmem>>, vector<1x128x256xbf16>
    %84 = vector.shape_cast %83 : vector<1x128x256xbf16> to vector<128x256xbf16>
    %cst_57 = arith.constant dense<0.000000e+00> : vector<1x256xf32>
    %85 = tpu.matmul %82, %84, %cst_57 {dimension_numbers = #tpu.dot_dimension_numbers<[1], [0], [0], [1], [0, 0, 1, 1], [], []>} : vector<1x128xbf16>, vector<128x256xbf16>, vector<1x256xf32> -> vector<1x256xf32>
    %86 = arith.addf %80, %85 : vector<1x256xf32>
    %87 = vector.extract_strided_slice %79 {offsets = [1, 0], sizes = [1, 128], strides = [1, 1]} : vector<4x128xf32> to vector<1x128xf32>
    %88 = arith.truncf %87 : vector<1x128xf32> to vector<1x128xbf16>
    %c1_58 = arith.constant 1 : index
    %c0_59 = arith.constant 0 : index
    %c0_60 = arith.constant 0 : index
    %89 = vector.load %arg8[%c1_58, %c0_59, %c0_60] : memref<4x128x256xbf16, #tpu.memory_space<vmem>>, vector<1x128x256xbf16>
    %90 = vector.shape_cast %89 : vector<1x128x256xbf16> to vector<128x256xbf16>
    %cst_61 = arith.constant dense<0.000000e+00> : vector<1x256xf32>
    %91 = tpu.matmul %88, %90, %cst_61 {dimension_numbers = #tpu.dot_dimension_numbers<[1], [0], [0], [1], [0, 0, 1, 1], [], []>} : vector<1x128xbf16>, vector<128x256xbf16>, vector<1x256xf32> -> vector<1x256xf32>
    %92 = arith.addf %86, %91 : vector<1x256xf32>
    %93 = vector.extract_strided_slice %79 {offsets = [2, 0], sizes = [1, 128], strides = [1, 1]} : vector<4x128xf32> to vector<1x128xf32>
    %94 = arith.truncf %93 : vector<1x128xf32> to vector<1x128xbf16>
    %c2_62 = arith.constant 2 : index
    %c0_63 = arith.constant 0 : index
    %c0_64 = arith.constant 0 : index
    %95 = vector.load %arg8[%c2_62, %c0_63, %c0_64] : memref<4x128x256xbf16, #tpu.memory_space<vmem>>, vector<1x128x256xbf16>
    %96 = vector.shape_cast %95 : vector<1x128x256xbf16> to vector<128x256xbf16>
    %cst_65 = arith.constant dense<0.000000e+00> : vector<1x256xf32>
    %97 = tpu.matmul %94, %96, %cst_65 {dimension_numbers = #tpu.dot_dimension_numbers<[1], [0], [0], [1], [0, 0, 1, 1], [], []>} : vector<1x128xbf16>, vector<128x256xbf16>, vector<1x256xf32> -> vector<1x256xf32>
    %98 = arith.addf %92, %97 : vector<1x256xf32>
    %99 = vector.extract_strided_slice %79 {offsets = [3, 0], sizes = [1, 128], strides = [1, 1]} : vector<4x128xf32> to vector<1x128xf32>
    %100 = arith.truncf %99 : vector<1x128xf32> to vector<1x128xbf16>
    %c3_66 = arith.constant 3 : index
    %c0_67 = arith.constant 0 : index
    %c0_68 = arith.constant 0 : index
    %101 = vector.load %arg8[%c3_66, %c0_67, %c0_68] : memref<4x128x256xbf16, #tpu.memory_space<vmem>>, vector<1x128x256xbf16>
    %102 = vector.shape_cast %101 : vector<1x128x256xbf16> to vector<128x256xbf16>
    %cst_69 = arith.constant dense<0.000000e+00> : vector<1x256xf32>
    %103 = tpu.matmul %100, %102, %cst_69 {dimension_numbers = #tpu.dot_dimension_numbers<[1], [0], [0], [1], [0, 0, 1, 1], [], []>} : vector<1x128xbf16>, vector<128x256xbf16>, vector<1x256xf32> -> vector<1x256xf32>
    %104 = arith.addf %98, %103 : vector<1x256xf32>
    %cst_70 = arith.constant 0.000000e+00 : f32
    %105 = vector.broadcast %cst_70 : f32 to vector<1x256xf32>
    %106 = arith.maximumf %104, %105 : vector<1x256xf32>
    %107 = arith.truncf %106 : vector<1x256xf32> to vector<1x256xbf16>
    %c0_71 = arith.constant 0 : index
    %c0_72 = arith.constant 0 : index
    %108 = vector.load %arg9[%c0_71, %c0_72] : memref<256x64xbf16, #tpu.memory_space<vmem>>, vector<256x64xbf16>
    %cst_73 = arith.constant dense<0.000000e+00> : vector<1x64xf32>
    %109 = tpu.matmul %107, %108, %cst_73 {dimension_numbers = #tpu.dot_dimension_numbers<[1], [0], [0], [1], [0, 0, 1, 1], [], []>} : vector<1x256xbf16>, vector<256x64xbf16>, vector<1x64xf32> -> vector<1x64xf32>
    %cst_74 = arith.constant 0.000000e+00 : f32
    %110 = vector.broadcast %cst_74 : f32 to vector<1x64xf32>
    %111 = arith.maximumf %109, %110 : vector<1x64xf32>
    %112 = arith.truncf %111 : vector<1x64xf32> to vector<1x64xbf16>
    %c0_75 = arith.constant 0 : index
    %c0_76 = arith.constant 0 : index
    %113 = vector.load %arg10[%c0_75, %c0_76] : memref<64x10xbf16, #tpu.memory_space<vmem>>, vector<64x10xbf16>
    %cst_77 = arith.constant dense<0.000000e+00> : vector<1x10xf32>
    %114 = tpu.matmul %112, %113, %cst_77 {dimension_numbers = #tpu.dot_dimension_numbers<[1], [0], [0], [1], [0, 0, 1, 1], [], []>} : vector<1x64xbf16>, vector<64x10xbf16>, vector<1x10xf32> -> vector<1x10xf32>
    %cst_78 = arith.constant dense<0xFF800000> : vector<1xf32>
    %115 = vector.multi_reduction <maximumf>, %114, %cst_78 [1] : vector<1x10xf32> to vector<1xf32>
    %116 = vector.shape_cast %115 : vector<1xf32> to vector<1x1xf32>
    %117 = vector.broadcast %116 : vector<1x1xf32> to vector<1x10xf32>
    %118 = arith.subf %114, %117 : vector<1x10xf32>
    %119 = math.exp %118 : vector<1x10xf32>
    %cst_79 = arith.constant dense<0.000000e+00> : vector<1xf32>
    %120 = vector.multi_reduction <add>, %119, %cst_79 [1] : vector<1x10xf32> to vector<1xf32>
    %121 = vector.shape_cast %120 : vector<1xf32> to vector<1x1xf32>
    %122 = math.log %121 : vector<1x1xf32>
    %123 = arith.addf %122, %116 : vector<1x1xf32>
    %124 = vector.broadcast %123 : vector<1x1xf32> to vector<1x10xf32>
    %125 = arith.subf %114, %124 : vector<1x10xf32>
    %c0_80 = arith.constant 0 : index
    %c0_81 = arith.constant 0 : index
    %c0_82 = arith.constant 0 : index
    %126 = vector.load %arg11[%c0_80, %c0_81, %c0_82] : memref<1x1x10xf32, #tpu.memory_space<vmem>>, vector<1x1x10xf32>
    %127 = vector.shape_cast %126 : vector<1x1x10xf32> to vector<1x10xf32>
    %128 = vector.shape_cast %125 : vector<1x10xf32> to vector<1x1x10xf32>
    tpu.vector_store %arg11[%c0_80, %c0_81, %c0_82], %128 {strides = array<i32>} : memref<1x1x10xf32, #tpu.memory_space<vmem>>, vector<1x1x10xf32>,
    return
  }
  func.func @transform_0(%arg0: i32) -> (i32, i32, i32) {
    %c0_i32 = arith.constant 0 : i32
    %c0_i32_0 = arith.constant 0 : i32
    %c0_i32_1 = arith.constant 0 : i32
    return %arg0, %c0_i32, %c0_i32_0 : i32, i32, i32
  }
  func.func @transform_1(%arg0: i32) -> (i32, i32, i32) {
    %c0_i32 = arith.constant 0 : i32
    %c0_i32_0 = arith.constant 0 : i32
    %c0_i32_1 = arith.constant 0 : i32
    %c0_i32_2 = arith.constant 0 : i32
    return %c0_i32, %c0_i32_0, %c0_i32_1 : i32, i32, i32
  }
  func.func @transform_2(%arg0: i32) -> (i32, i32) {
    %c0_i32 = arith.constant 0 : i32
    %c0_i32_0 = arith.constant 0 : i32
    %c0_i32_1 = arith.constant 0 : i32
    return %c0_i32, %c0_i32_0 : i32, i32
  }
  func.func @transform_3(%arg0: i32) -> (i32, i32) {
    %c0_i32 = arith.constant 0 : i32
    %c0_i32_0 = arith.constant 0 : i32
    %c0_i32_1 = arith.constant 0 : i32
    return %c0_i32, %c0_i32_0 : i32, i32
  }
  func.func @transform_4(%arg0: i32) -> (i32, i32, i32) {
    %c0_i32 = arith.constant 0 : i32
    %c0_i32_0 = arith.constant 0 : i32
    %c0_i32_1 = arith.constant 0 : i32
    %c0_i32_2 = arith.constant 0 : i32
    return %c0_i32, %c0_i32_0, %c0_i32_1 : i32, i32, i32
  }
  func.func @transform_5(%arg0: i32) -> (i32, i32) {
    %c0_i32 = arith.constant 0 : i32
    %c0_i32_0 = arith.constant 0 : i32
    %c0_i32_1 = arith.constant 0 : i32
    return %c0_i32, %c0_i32_0 : i32, i32
  }
  func.func @transform_6(%arg0: i32) -> (i32, i32) {
    %c0_i32 = arith.constant 0 : i32
    %c0_i32_0 = arith.constant 0 : i32
    %c0_i32_1 = arith.constant 0 : i32
    return %c0_i32, %c0_i32_0 : i32, i32
  }
  func.func @transform_7(%arg0: i32) -> (i32, i32, i32) {
    %c0_i32 = arith.constant 0 : i32
    %c0_i32_0 = arith.constant 0 : i32
    %c0_i32_1 = arith.constant 0 : i32
    %c0_i32_2 = arith.constant 0 : i32
    return %c0_i32, %c0_i32_0, %c0_i32_1 : i32, i32, i32
  }
  func.func @transform_8(%arg0: i32) -> (i32, i32) {
    %c0_i32 = arith.constant 0 : i32
    %c0_i32_0 = arith.constant 0 : i32
    %c0_i32_1 = arith.constant 0 : i32
    return %c0_i32, %c0_i32_0 : i32, i32
  }
  func.func @transform_9(%arg0: i32) -> (i32, i32) {
    %c0_i32 = arith.constant 0 : i32
    %c0_i32_0 = arith.constant 0 : i32
    %c0_i32_1 = arith.constant 0 : i32
    return %c0_i32, %c0_i32_0 : i32, i32
  }
  func.func @transform_10(%arg0: i32) -> (i32, i32, i32) {
    %c0_i32 = arith.constant 0 : i32
    %c0_i32_0 = arith.constant 0 : i32
    %c0_i32_1 = arith.constant 0 : i32
    return %arg0, %c0_i32, %c0_i32_0 : i32, i32, i32
  }
}

</mosaic_0001>

<bundles_post_ra>
// kernel: lenet5_forward.1
= control target key start
LH: loop header
LB: loop body
LE: loop exit
PB: predicated region body
PF: predicated region fallthrough
CT: control target
= control target key end

     0   :  { %s6212_s0 = inlined_call_operand.vmem [shape: f32[2,28,28], index: 0, kind: input, shape index: {}]   ;;  %s6213_s1 = inlined_call_operand.hbm [shape: bf16[5,28,384], index: 1, kind: input, shape index: {}]   ;;  %s6214_s2 = inlined_call_operand.hbm [shape: bf16[12,24], index: 2, kind: input, shape index: {}]   ;;  %s6215_s3 = inlined_call_operand.vmem [shape: bf16[384,192], index: 3, kind: input, shape index: {}]   ;;  %s6216_s4 = inlined_call_operand.vmem [shape: bf16[5,192,256], index: 4, kind: input, shape index: {}]   ;;  %s6217_s5 = inlined_call_operand.vmem [shape: bf16[4,8], index: 5, kind: input, shape index: {}]   ;;  %s6218_s6 = inlined_call_operand.vmem [shape: bf16[256,128], index: 6, kind: input, shape index: {}]   ;;  %s6219_s7 = inlined_call_operand.hbm [shape: bf16[4,128,256], index: 7, kind: input, shape index: {}]   ;;  %s6220_s8 = inlined_call_operand.vmem [shape: bf16[256,64], index: 8, kind: input, shape index: {}]   ;;  %s6221_s9 = inlined_call_operand.vmem [shape: bf16[64,10], index: 9, kind: input, shape index: {}]   ;;  %s6222_s10 = inlined_call_operand.hbm [shape: f32[2,1,10], index: 10, kind: output, shape index: {}]  }
   0x1   :  { %6231 = sst [smem:[#allocation17_spill]] %s6214_s2 }
   0x2   :  { %15 = vsyncpa [#allocation3], 0 }
   0x3   :  { %16 = vsyncpa [#allocation6], 0 }
   0x4   :  { %17 = vsyncpa [#allocation4], 0 }
   0x5   :  { %19 = vsyncpa [#allocation4 + $0x1], 0  ;;  %s5262_s13 = smov 0   ;;  %s5264_s14 = smov 0  }
   0x6   :  { %s5266_s15 = smov 0   ;;  %s5268_s16 = smov 0  }
   0x7 LB: > { %6232 = sst [smem:[#allocation12_spill]] %s5180_s13  ;;  %s5283_s17 = sadd.s32 4294967295, %s5192_s16   ;;  %s5192_s16 = sphi %s5268_s16, %s6252_s16   ;;  %s5188_s15 = sphi %s5266_s15, %s6254_s15   ;;  %s5184_s14 = sphi %s5264_s14, %s6256_s14   ;;  %s5180_s13 = sphi %s5262_s13, %s6255_s13  }
   0x8   : > { %6233 = sst [smem:[#allocation13_spill]] %s5188_s15  ;;  %s3866_s18 = sadd.s32 4294967294, %s5192_s16  }
   0x9   : > { %s5287_s19 = sadd.s32 1, %s5192_s16   ;;  %s247_s20 = sadd.s32 1, %s5188_s15 }
   0xa   : > { %6234 = sst [smem:[#allocation14_spill]] %s5287_s19  ;;  %s244_s21 = ssub.s32 %s5192_s16, %s5287_s19 }
   0xb   : > { %p257_p0 = scmp.ne.s32.totalorder %s5188_s15, %s5184_s14  ;;  %p245_p1 = scmp.eq.s32.totalorder %s244_s21, 0 }
   0xc   : > { %p258_p2 = scmp.eq.s32.totalorder %s5283_s17, 1  ;;  %p263_p3 = scmp.ne.s32.totalorder %s5184_s14, %s5180_s13 }
   0xd   : > { %p264_p4 = scmp.eq.s32.totalorder %s3866_s18, 1  ;;  %p3867_p7 = scmp.ge.s32.totalorder %s5192_s16, 1 }
   0xe   : > { %s5298_s22 = scalar_select %p245_p1, %s5188_s15, %s247_s20  }
   0xf   : > { %p5300_p5 = por %p258_p2, %p257_p0  ;;  %p5304_p6 = por %p264_p4, %p263_p3 }
  0x10   : > { %6235 = sst [smem:[#allocation15_spill]] %s5298_s22  ;;  %p271_p8 = scmp.lt.s32.totalorder %s5192_s16, 3 }
  0x11   : > { %s6236_s23 = scalar_select %p5300_p5, 1, 0 }
  0x12   : > { %s6237_s24 = scalar_select %p5304_p6, 1, 0 }
  0x13   : > { %p6223_p9 = scmp.eq.s32.totalorder %s5283_s17, 0  ;;  %p5311_p10 = pnand %p3867_p7, %p271_p8 }
  0x14   : > { %6238 = sst [smem:[#allocation16_spill]] %s6237_s24  ;;  %s5194_s26 = smov [#allocation5]  }
  0x15   : > { %s6239_s25 = scalar_select %p5311_p10, 1, 0 }
  0x16   : > { %s296_s27 = sshll.u32 %s5194_s26, 4  ;;  %p4544_p11 = pneg %p5311_p10  ;;  %s297_s27 = int_to_ptr.vmem [resolvable:$true] %s296_s27 }
  0x17   : > { %s5195_s29 = smov [#allocation2]   ;;  %s6241_s2 = sld [smem:[#allocation17_spill]] }
  0x18   : > { %p5319_p12 = pnand %p6223_p9, %p4544_p11  ;;  %s283_s30 = sshll.u32 %s5195_s29, 4  ;;  %s5323_s30 = int_to_ptr.vmem [resolvable:$true] %s283_s30 }
  0x1a   : > { %p5333_p0 = pneg %p5319_p12 }
  0x1d   : > { %s5038_s18 = scalar_lea.hbm %s6241_s2, 128 }
  0x1e   : > { %p5039_p13 = scmp.ne.s32.totalorder %s6241_s2, %s5038_s18  ;;  %p5045_p3 = scmp.lt.u32.totalorder %s5038_s18, %s6241_s2 }
  0x20   : > { %p5041_p1 = pnand %p5333_p0, %p5039_p13 }
  0x22   : > { %p5042_p2 = pneg %p5041_p1 }
  0x24   : > { %p5047_p4 = pnand %p5045_p3, %p5042_p2 }
  0x26   : > { %5050 = shalt.err (!%p5047_p4)
}
  0x27   : > { %s5051_s11 = scalar_lea.vmem %s297_s27, 128  ;;  %p5059_p9 = scmp.lt.s32.totalorder %s297_s27, %s297_s27 }
  0x28   : > { %p5052_p7 = scmp.ne.s32.totalorder %s297_s27, %s5051_s11  ;;  %p5060_p6 = scmp.lt.s32.totalorder %s5051_s11, %s5051_s11 }
  0x2a   : > { %p5054_p8 = pnand %p5052_p7, %p5333_p0  ;;  %p5061_p5 = por %p5060_p6, %p5059_p9 }
  0x2c   : > { %p5055_p11 = pneg %p5054_p8 }
  0x2e   : > { %p5062_p10 = pnand %p5061_p5, %p5055_p11 }
  0x30   : > { %5065 = shalt.err (!%p5062_p10)
}
  0x31   : > { %s5196_s12 = smov 64   ;;  %s5197_s20 = smov 4  }
  0x32   : > { %4550 = dma.hbm_to_vmem [thread:$0]  (!%p5319_p12), %s6241_s2, 128, %s297_s27, [#allocation6], %s5196_s12, %s5196_s12, %s5197_s20  }
  0x33   : > { %s5066_s15 = scalar_lea.hbm %s6213_s1, 3840 }
  0x34   : > { %p5067_p13 = scmp.ne.s32.totalorder %s6213_s1, %s5066_s15  ;;  %p5073_p9 = scmp.lt.u32.totalorder %s5066_s15, %s6213_s1 }
  0x36   : > { %p5069_p5 = pnand %p5067_p13, %p5333_p0 }
  0x38   : > { %p5070_p6 = pneg %p5069_p5 }
  0x3a   : > { %p5075_p10 = pnand %p5073_p9, %p5070_p6 }
  0x3c   : > { %5078 = shalt.err (!%p5075_p10)
}
  0x3d   : > { %s5079_s27 = scalar_lea.vmem %s5323_s30, 3840  ;;  %p5087_p4 = scmp.lt.s32.totalorder %s5323_s30, %s5323_s30 }
  0x3e   : > { %p5080_p1 = scmp.ne.s32.totalorder %s5323_s30, %s5079_s27  ;;  %p5088_p7 = scmp.lt.s32.totalorder %s5079_s27, %s5079_s27 }
  0x40   : > { %p5082_p2 = pnand %p5080_p1, %p5333_p0  ;;  %p5089_p8 = por %p5088_p7, %p5087_p4 }
  0x42   : > { %p5083_p3 = pneg %p5082_p2 }
  0x44   : > { %p5090_p11 = pnand %p5089_p8, %p5083_p3 }
  0x46   : > { %5093 = shalt.err (!%p5090_p11)
}
  0x47   : > { %s5198_s19 = smov 192   ;;  %s5199_s13 = smov 12  }
  0x48   : > { %4547 = dma.hbm_to_vmem [thread:$0]  (!%p5319_p12), %s6213_s1, 3840, %s5323_s30, [#allocation3], %s5198_s19, %s5198_s19, %s5199_s13  }
  0x49   : > { %s5200_s12 = smov [#allocation7]   ;;  %s5094_s21 = scalar_lea.hbm %s6219_s7, 8192 }
  0x4a   : > { %s321_s20 = sshll.u32 %s5200_s12, 4  ;;  %p5095_p13 = scmp.ne.s32.totalorder %s6219_s7, %s5094_s21  ;;  %s322_s20 = int_to_ptr.vmem [resolvable:$true] %s321_s20 }
  0x4b   : > { %p5101_p9 = scmp.lt.u32.totalorder %s5094_s21, %s6219_s7 }
  0x4c   : > { %p5097_p5 = pnand %p5095_p13, %p5333_p0 }
  0x4e   : > { %p5098_p6 = pneg %p5097_p5 }
  0x50   : > { %p5103_p10 = pnand %p5101_p9, %p5098_p6 }
  0x52   : > { %5106 = shalt.err (!%p5103_p10)
}
  0x53   : > { %s5107_s30 = scalar_lea.vmem %s322_s20, 8192  ;;  %p5115_p4 = scmp.lt.s32.totalorder %s322_s20, %s322_s20 }
  0x54   : > { %p5108_p1 = scmp.ne.s32.totalorder %s322_s20, %s5107_s30  ;;  %p5116_p7 = scmp.lt.s32.totalorder %s5107_s30, %s5107_s30 }
  0x56   : > { %p5110_p2 = pnand %p5108_p1, %p5333_p0  ;;  %p5117_p8 = por %p5116_p7, %p5115_p4 }
  0x58   : > { %p5111_p3 = pneg %p5110_p2 }
  0x5a   : > { %p5118_p11 = pnand %p5117_p8, %p5111_p3 }
  0x5c   : > { %5121 = shalt.err (!%p5118_p11)
}
  0x5d   : > { %s5201_s19 = smov 128   ;;  %s5202_s13 = smov 8  }
  0x5e   : > { %4553 = dma.hbm_to_vmem [thread:$0]  (!%p5319_p12), %s6219_s7, 8192, %s322_s20, [#allocation6], %s5201_s19, %s5201_s19, %s5202_s13  }
  0x5f   : > { %p6243_p13 = scmp.ne.s32.totalorder %s6239_s25, 0 }
  0x60   : > { %p6244_p5 = scmp.eq.s32.totalorder (!%p6243_p13), %s5283_s17, 0 }
  0x61   : > { %351 = sbr.rel (%p6243_p13) target bundleno = 2817 (0xb01), region = 60 }
  0x68   : > { %5167 = dma.done.wait (%p6244_p5), [#allocation3], 3840   ;;  %p6245_p0 = pmov %p6244_p5 }
  0x6a   : > { %5169 = vsyncadd (%p6245_p0), [#allocation3], 4294963456  ;;  %p6246_p6 = pmov %p6245_p0 }
  0x6b   : > { %p6247_p9 = pmov %p6245_p0 }
  0x6c   : > { %5171 = dma.done.wait (%p6246_p6), [#allocation6], 8320  }
  0x6d   : > { %5173 = vsyncadd (%p6247_p9), [#allocation6], 4294958976  ;;  %p396_p10 = scmp.lt.s32.totalorder %s5283_s17, 1  ;;  %v5203_v0 = vmov 0   ;;  %v4609_v1 = vld [vmem:[#allocation2 + $0x34] ss:$12 sps:$4 sm:$0xff]  }
  0x6e   : > { %520 = vmatprep.mubr.bf16.mxu0 %v5203_v0  ;;  %v4611_v2 = vld [vmem:[#allocation2 + $0x30] ss:$12 sps:$4 sm:$0xff]   ;;  %488 = vmatprep.subr.bf16.mxu0 %v4609_v1  ;;  %v4612_v3 = vld [vmem:[#allocation2 + $0x38] ss:$12 sps:$4 sm:$0xff]   ;;  %vm478_vm0 = vcmask 1045504   ;;  %vm471_vm2 = vcmask 228352  }
  0x6f   : > { %s397_s25 = scalar_select %p396_p10, %s5283_s17, 1  ;;  %489 = vmatpush1.bf16.msra.mxu0 %v4611_v2  ;;  %v4613_v4 = vld [vmem:[#allocation2 + $0x4c] ss:$12 sps:$4 sm:$0x3f]   ;;  %4385 = vmatprep.subr.bf16.mxu1 %v4612_v3  ;;  %v4619_v15 = vld [vmem:[#allocation2 + $0x4] ss:$12 sps:$4 sm:$0xff]  }
  0x70   : > { %v4615_v5 = vld [vmem:[#allocation2 + $0x48] ss:$12 sps:$4 sm:$0x3f]   ;;  %4386 = vmatpush3.bf16.msra.mxu1 %v4612_v3  ;;  %3884 = vmatprep.subr.msk.bf16.mxu0 %vm478_vm0, %v4613_v4  ;;  %v4616_v8 = vld [vmem:[#allocation2 + $0x50] ss:$12 sps:$4 sm:$0x3f]  }
  0x71   : > { %s4312_s28 = sshll.u32 %s397_s25, 5  ;;  %v480_v7 = vsel %vm478_vm0, %v4615_v5, 0  ;;  %4525 = vmatprep.subr.msk.bf16.mxu1 %vm478_vm0, %v4616_v8  ;;  %v486_v13 = vsel %vm478_vm0, %v4616_v8, 0  ;;  %v4620_v20 = vld [vmem:[#allocation2 + $0x8] ss:$12 sps:$4 sm:$0xff]   ;;  %vm740_vm3 = vcmask 1046528  }
  0x72   : > { %s400_s12 = scalar_lea.vmem %s6212_s0, %s4312_s28  ;;  %vm426_vm1 = vsmask.f32 7424  ;;  %v4617_v23 = vld [vmem:[#allocation2] ss:$12 sps:$4 sm:$0xff]   ;;  %v4625_v31 = vld [vmem:[#allocation2 + $0x68] ss:$12 sps:$4 sm:$0xff]  }
  0x73   : > { %v402_v6 = vld [vmem:[%s400_s12] sm:$0xff]  ;;  %v403_v9 = vld [vmem:[%s400_s12 + $0x8] sm:$0xff]  ;;  %v404_v10 = vld [vmem:[%s400_s12 + $0x10] sm:$0xff]  ;;  %491 = vmatpush1.bf16.msra.mxu0 %v480_v7  ;;  %vm905_vm4 = vsmask.f32 6400  ;;  %vm1256_vm5 = vcmask 1043456  }
  0x74   : > { %v405_v11 = vld [vmem:[%s400_s12 + $0x18] sm:$0xf]  ;;  %v5408_v12 = vpack.c.bf16 %v403_v9, %v402_v6  ;;  %4388 = vmatpush3.bf16.msra.mxu1 %v486_v13  ;;  %630 = vmatprep.subr.bf16.mxu0 %v4619_v15  ;;  %v4621_v25 = vld [vmem:[#allocation2 + $0x20] ss:$12 sps:$4 sm:$0x3f]   ;;  %v407_v36 = vpack.c.bf16 %v404_v10, %v404_v10  ;;  %vm1252_vm6 = vcmask 195584  }
  0x75   : > { %v5412_v14 = vpack.c.bf16 %v405_v11, %v404_v10  ;;  %4393 = vmatprep.subr.bf16.mxu1 %v4620_v20  ;;  %v4624_v27 = vld [vmem:[#allocation2 + $0x18] ss:$12 sps:$4 sm:$0x3f]   ;;  %v4622_v29 = vld [vmem:[#allocation2 + $0x1c] ss:$12 sps:$4 sm:$0x3f]  }
  0x76   : > { %v428_v16 = vshrl.u32 %v5408_v12, 16  ;;  %v430_v17 = vshll.u32 %v5408_v12, 16  ;;  %v622_v30 = vsel %vm478_vm0, %v4624_v27, 0  ;;  %v4628_v32 = vld [vmem:[#allocation2 + $0x64] ss:$12 sps:$4 sm:$0xff]   ;;  %v628_v33 = vsel %vm478_vm0, %v4621_v25, 0 }
  0x77   : > { %v435_v18 = vshll.u32 %v5412_v14, 16  ;;  %v439_v19 = vshrl.u32 %v5412_v14, 16  ;;  %v741_v34 = vrot.slane %v5408_v12, 1  ;;  %v5430_v35 = vrot.slane %v5412_v14, 1  ;;  %v4626_v38 = vld [vmem:[#allocation2 + $0x60] ss:$12 sps:$4 sm:$0xff]  }
  0x78   : > { %v432_v21 = vrot.slane %v430_v17, 1  ;;  %v4629_v37 = vld [vmem:[#allocation2 + $0x80] ss:$12 sps:$4 sm:$0x3f]   ;;  %v4633_v43 = vld [vmem:[#allocation2 + $0x98] ss:$12 sps:$4 sm:$0xff]  }
  0x79   : > { %v437_v22 = vrot.slane %v435_v18, 1  ;;  %v743_v39 = vsel %vm740_vm3, %v741_v34, %v5430_v35  ;;  %v4630_v40 = vld [vmem:[#allocation2 + $0x7c] ss:$12 sps:$4 sm:$0x3f]   ;;  %v786_v41 = vsel %vm478_vm0, %v4629_v37, 0  ;;  %v906_v44 = vrot.slane %v428_v16, 1 }
  0x7a   : > { %v433_v24 = vor.u32 %v432_v21, %v428_v16  ;;  %v4632_v42 = vld [vmem:[#allocation2 + $0x78] ss:$12 sps:$4 sm:$0x3f]   ;;  %v907_v45 = vrot.slane %v430_v17, 2  ;;  %v909_v46 = vrot.slane %v439_v19, 1  ;;  %v910_v47 = vrot.slane %v435_v18, 2 }
  0x7b   : > { %v441_v26 = vor.u32 %v439_v19, %v437_v22  ;;  %v4637_v48 = vld [vmem:[#allocation2 + $0x94] ss:$12 sps:$4 sm:$0xff]   ;;  %v780_v49 = vsel %vm478_vm0, %v4632_v42, 0  ;;  %v4634_v52 = vld [vmem:[#allocation2 + $0xb0] ss:$12 sps:$4 sm:$0x3f]  }
  0x7c   : > { %v438_v28 = vsel %vm426_vm1, %v433_v24, %v437_v22  ;;  %v908_v50 = vor.u32 %v907_v45, %v906_v44  ;;  %v911_v51 = vor.u32 %v910_v47, %v909_v46  ;;  %v4638_v54 = vld [vmem:[#allocation2 + $0xc8] ss:$12 sps:$4 sm:$0xff]   ;;  %v955_v55 = vsel %vm478_vm0, %v4634_v52, 0  ;;  %v4635_v56 = vld [vmem:[#allocation2 + $0x90] ss:$12 sps:$4 sm:$0xff]   ;;  %s394_s18 = sand.u32 1, %s5184_s14  }
  0x7d   : > { %3885 = vmatmul.mubr.msk.bf16.vlgmr.msra.gmra.mrb[0].mxu0 %vm471_vm2, %v438_v28  ;;  %4389 = vmatprep.mubr.msk.bf16.mxu1 %vm471_vm2, %v438_v28  ;;  %v4639_v57 = vld [vmem:[#allocation2 + $0xac] ss:$12 sps:$4 sm:$0x3f]   ;;  %v4641_v58 = vld [vmem:[#allocation2 + $0xa8] ss:$12 sps:$4 sm:$0x3f]  }
  0x7e   : > { %4390 = vmatmul.mubr.msk.bf16.vlgmr.msra.gmra.mrb[0].mxu1 %vm471_vm2, %v441_v26  ;;  %631 = vmatpush1.bf16.msra.mxu0 %v4617_v23  ;;  %v912_v53 = vsel %vm905_vm4, %v908_v50, %v911_v51  ;;  %v1075_v59 = vrot.slane %v5408_v12, 2  ;;  %v1076_v60 = vrot.slane %v5412_v14, 2  ;;  %v4642_v61 = vld [vmem:[#allocation2 + $0xe0] ss:$12 sps:$4 sm:$0x3f]   ;;  %v949_v63 = vsel %vm478_vm0, %v4641_v58, 0 }
  0x7f   : > { %4394 = vmatpush3.bf16.msra.mxu1 %v4620_v20  ;;  %530 = vmatprep.mubr.bf16.mxu0 %v5203_v0  ;;  %v4645_v62 = vld [vmem:[#allocation2 + $0xc4] ss:$12 sps:$4 sm:$0xff]   ;;  %v1120_v2 = vsel %vm478_vm0, %v4642_v61, 0  ;;  %v4643_v3 = vld [vmem:[#allocation2 + $0xc0] ss:$12 sps:$4 sm:$0xff]   ;;  %vm5205_vm7 = vmmov 0  }
  0x80   : > { %4526 = vmatprep.subr.msk.bf16.mxu1 %vm478_vm0, %v4621_v25  ;;  %3895 = vmatprep.subr.msk.bf16.mxu0 %vm478_vm0, %v4622_v29  ;;  %v1077_v1 = vsel %vm478_vm0, %v1075_v59, %v1076_v60  ;;  %v4646_v4 = vld [vmem:[#allocation2 + $0xdc] ss:$12 sps:$4 sm:$0x3f]   ;;  %v4648_v5 = vld [vmem:[#allocation2 + $0xd8] ss:$12 sps:$4 sm:$0x3f]  }
  0x81   : > { %4397 = vmatprep.mubr.msk.bf16.mxu1 %vm471_vm2, %v5408_v12  ;;  %v1114_v6 = vsel %vm478_vm0, %v4648_v5, 0  ;;  %v4649_v34 = vld [vmem:[#allocation5] sm:$0x3f]   ;;  %v4658_v42 = vld [vmem:[%s6215_s3 + $0x24] ss:$8 sps:$4 sm:$0xff]   ;;  %vm1915_vm8 = vcmask 523264  }
  0x82   : > { %633 = vmatpush1.bf16.msra.mxu0 %v622_v30  ;;  %v4661_v44 = vld [vmem:[%s6215_s3 + $0x34] ss:$8 sps:$4 sm:$0xff]   ;;  %v4659_v45 = vld [vmem:[%s6215_s3 + $0x30] ss:$8 sps:$4 sm:$0xff]   ;;  %v4664_v46 = vld [vmem:[%s6215_s3 + $0x44] ss:$8 sps:$4 sm:$0xff]  }
  0x83   : > { %4396 = vmatpush3.bf16.msra.mxu1 %v628_v33  ;;  %788 = vmatprep.subr.bf16.mxu0 %v4628_v32  ;;  %v4662_v47 = vld [vmem:[%s6215_s3 + $0x40] ss:$8 sps:$4 sm:$0xff]   ;;  %v4670_v50 = vld [vmem:[%s6215_s3 + $0x64] ss:$8 sps:$4 sm:$0xff]   ;;  %v4697_v5 = vld [vmem:[%s6215_s3 + $0xf4] ss:$8 sps:$4 sm:$0xff]  }
  0x84   : > { %4401 = vmatprep.subr.bf16.mxu1 %v4625_v31  ;;  %v4682_v58 = vld [vmem:[%s6215_s3 + $0xa4] ss:$8 sps:$4 sm:$0xff]   ;;  %v4680_v59 = vld [vmem:[%s6215_s3 + $0xa0] ss:$8 sps:$4 sm:$0xff]   ;;  %vm2717_vm9 = vcmask 64512   ;;  %vm3752_vm10 = vcmask 73728  }
  0x85   : > { %3886 = vmatmul.mubr.msk.bf16.gmra.mrb[4].mxu0 %vm471_vm2, %v441_v26  ;;  %s4309_s21 = sshll.u32 %s5283_s17, 4  ;;  %s395_s29 = scalar_lea.vmem [#allocation8], %s394_s18 }
  0x86   : > { %662 = vmatprep.mubr.bf16.mxu0 %v5203_v0  ;;  %s3780_s11 = sshll.u32 %s395_s29, 4  ;;  %s6169_s19 = scalar_lea.hbm %s6222_s10, %s4309_s21  ;;  %s6171_s11 = int_to_ptr.vmem [resolvable:$true] %s3780_s11 }
  0x87   : > { %s3768_s13 = scalar_lea.sflag [#allocation4], %s394_s18  ;;  %s5122_s15 = scalar_lea.vmem %s6171_s11, 16 }
  0x88   : > { %p5123_p12 = scmp.ne.s32.totalorder %s6171_s11, %s5122_s15  ;;  %p6248_p1 = scmp.ne.s32.totalorder %s6236_s23, 0 }
  0x89   : > { %s5206_s17 = smov [#allocation8]  }
  0x8a   : > { %4398 = vmatmul.mubr.msk.bf16.vlgmr.msra.gmra.mrb[0].mxu1 %vm471_vm2, %v407_v36  ;;  %p5124_p2 = pnand %p5123_p12, %p6248_p1  ;;  %s5126_s2 = sshll.u32 %s5206_s17, 4  ;;  %s5127_s2 = int_to_ptr.vmem [resolvable:$false] %s5126_s2 }
  0x8b   : > { %4402 = vmatpush3.bf16.msra.mxu1 %v4625_v31  ;;  %4405 = vmatprep.mubr.msk.bf16.mxu1 %vm471_vm2, %v743_v39  ;;  %s5128_s25 = scalar_lea.vmem %s5127_s2, 32  ;;  %p5129_p4 = scmp.lt.s32.totalorder %s6171_s11, %s5127_s2 }
  0x8c   : > { %4527 = vmatprep.subr.msk.bf16.mxu1 %vm478_vm0, %v4629_v37  ;;  %v4652_v37 = vld [vmem:[%s6215_s3 + $0x4] ss:$8 sps:$4 sm:$0xff]   ;;  %p5125_p3 = pneg %p5124_p2  ;;  %p5130_p7 = scmp.lt.s32.totalorder %s5128_s25, %s5122_s15 }
  0x8d   : > { %3896 = vmatmul.mubr.msk.bf16.vlgmr.msra.gmra.mrb[0].mxu0 %vm471_vm2, %v5408_v12 }
  0x8e   : > { %789 = vmatpush1.bf16.msra.mxu0 %v4626_v38  ;;  %672 = vmatprep.mubr.bf16.mxu0 %v5203_v0  ;;  %p5131_p8 = por %p5130_p7, %p5129_p4 }
  0x8f   : > { %4404 = vmatpush3.bf16.msra.mxu1 %v786_v41  ;;  %3906 = vmatprep.subr.msk.bf16.mxu0 %vm478_vm0, %v4630_v40  ;;  %v4655_v40 = vld [vmem:[%s6215_s3 + $0x14] ss:$8 sps:$4 sm:$0xff]   ;;  %v4653_v41 = vld [vmem:[%s6215_s3 + $0x10] ss:$8 sps:$4 sm:$0xff]  }
  0x90   : > { %4409 = vmatprep.subr.bf16.mxu1 %v4633_v43  ;;  %p5132_p11 = pnand %p5131_p8, %p5125_p3 }
  0x92   : > { %791 = vmatpush1.bf16.msra.mxu0 %v780_v49  ;;  %v4665_v49 = vld [vmem:[%s6215_s3 + $0x50] ss:$8 sps:$4 sm:$0xff]  }
  0x93   : > { %957 = vmatprep.subr.bf16.mxu0 %v4637_v48  ;;  %v4667_v48 = vld [vmem:[%s6215_s3 + $0x54] ss:$8 sps:$4 sm:$0xff]  }
  0x95   : > { %3897 = vmatmul.mubr.msk.bf16.gmra.mrb[4].mxu0 %vm471_vm2, %v407_v36 }
  0x96   : > { %4406 = vmatmul.mubr.msk.bf16.vlgmr.msra.gmra.mrb[0].mxu1 %vm471_vm2, %v5430_v35  ;;  %820 = vmatprep.mubr.bf16.mxu0 %v5203_v0 }
  0x97   : > { %4410 = vmatpush3.bf16.msra.mxu1 %v4633_v43  ;;  %4413 = vmatprep.mubr.msk.bf16.mxu1 %vm471_vm2, %v912_v53  ;;  %v4656_v43 = vld [vmem:[%s6215_s3 + $0x20] ss:$8 sps:$4 sm:$0xff]  }
  0x98   : > { %4528 = vmatprep.subr.msk.bf16.mxu1 %vm478_vm0, %v4634_v52  ;;  %v4673_v52 = vld [vmem:[%s6215_s3 + $0x74] ss:$8 sps:$4 sm:$0xff]  }
  0x9b   : > { %4412 = vmatpush3.bf16.msra.mxu1 %v955_v55  ;;  %v4674_v55 = vld [vmem:[%s6215_s3 + $0x80] ss:$8 sps:$4 sm:$0xff]  }
  0x9c   : > { %4417 = vmatprep.subr.bf16.mxu1 %v4638_v54 }
  0x9d   : > { %3907 = vmatmul.mubr.msk.bf16.vlgmr.msra.gmra.mrb[0].mxu0 %vm471_vm2, %v743_v39  ;;  %v4650_v39 = vld [vmem:[%s6215_s3] ss:$8 sps:$4 sm:$0xff]  }
  0x9e   : > { %958 = vmatpush1.bf16.msra.mxu0 %v4635_v56  ;;  %830 = vmatprep.mubr.bf16.mxu0 %v5203_v0  ;;  %v4679_v56 = vld [vmem:[%s6215_s3 + $0x94] ss:$8 sps:$4 sm:$0xff]  }
  0x9f   : > { %3917 = vmatprep.subr.msk.bf16.mxu0 %vm478_vm0, %v4639_v57  ;;  %v4677_v57 = vld [vmem:[%s6215_s3 + $0x90] ss:$8 sps:$4 sm:$0xff]  }
  0xa2   : > { %4414 = vmatmul.mubr.msk.bf16.vlgmr.msra.gmra.mrb[0].mxu1 %vm471_vm2, %v911_v51  ;;  %960 = vmatpush1.bf16.msra.mxu0 %v949_v63  ;;  %v4686_v63 = vld [vmem:[%s6215_s3 + $0xc0] ss:$8 sps:$4 sm:$0xff]  }
  0xa3   : > { %4418 = vmatpush3.bf16.msra.mxu1 %v4638_v54  ;;  %4421 = vmatprep.mubr.msk.bf16.mxu1 %vm471_vm2, %v1077_v1  ;;  %v4676_v54 = vld [vmem:[%s6215_s3 + $0x84] ss:$8 sps:$4 sm:$0xff]  }
  0xa4   : > { %4529 = vmatprep.subr.msk.bf16.mxu1 %vm478_vm0, %v4642_v61  ;;  %1122 = vmatprep.subr.bf16.mxu0 %v4645_v62  ;;  %v4683_v61 = vld [vmem:[%s6215_s3 + $0xb0] ss:$8 sps:$4 sm:$0xff]   ;;  %v4688_v62 = vld [vmem:[%s6215_s3 + $0xc4] ss:$8 sps:$4 sm:$0xff]  }
  0xa5   : > { %3908 = vmatmul.mubr.msk.bf16.gmra.mrb[4].mxu0 %vm471_vm2, %v5430_v35  ;;  %v5204_v35 = vmov 0.0  }
  0xa6   : > { %989 = vmatprep.mubr.bf16.mxu0 %v5203_v0 }
  0xa7   : > { %4420 = vmatpush3.bf16.msra.mxu1 %v1120_v2  ;;  %v4689_v2 = vld [vmem:[%s6215_s3 + $0xd0] ss:$8 sps:$4 sm:$0xff]  }
  0xad   : > { %3918 = vmatmul.mubr.msk.bf16.vlgmr.msra.gmra.mrb[0].mxu0 %vm471_vm2, %v912_v53  ;;  %v4671_v53 = vld [vmem:[%s6215_s3 + $0x70] ss:$8 sps:$4 sm:$0xff]  }
  0xae   : > { %4422 = vmatmul.mubr.msk.bf16.vlgmr.msra.gmra.mrb[0].mxu1 %vm471_vm2, %v1076_v60  ;;  %1123 = vmatpush1.bf16.msra.mxu0 %v4643_v3  ;;  %v4694_v3 = vld [vmem:[%s6215_s3 + $0xe4] ss:$8 sps:$4 sm:$0xff]  }
  0xaf   : > { %999 = vmatprep.mubr.bf16.mxu0 %v5203_v0  ;;  %3928 = vmatprep.subr.msk.bf16.mxu0 %vm478_vm0, %v4646_v4  ;;  %v4692_v4 = vld [vmem:[%s6215_s3 + $0xe0] ss:$8 sps:$4 sm:$0xff]  }
  0xb0   : > { %1298 = vmatprep.mubr.bf16.mxu1 %v5203_v0 }
  0xb2   : > { %1125 = vmatpush1.bf16.msra.mxu0 %v1114_v6  ;;  %v4695_v6 = vld [vmem:[%s6215_s3 + $0xf0] ss:$8 sps:$4 sm:$0xff]  }
  0xb5   : > { %3919 = vmatmul.mubr.msk.bf16.gmra.mrb[4].mxu0 %vm471_vm2, %v911_v51  ;;  %v4668_v51 = vld [vmem:[%s6215_s3 + $0x60] ss:$8 sps:$4 sm:$0xff]  }
  0xb6   : > { %1154 = vmatprep.mubr.bf16.mxu0 %v5203_v0 }
  0xbd   : > { %3929 = vmatmul.mubr.msk.bf16.vlgmr.msra.gmra.mrb[0].mxu0 %vm471_vm2, %v1077_v1  ;;  %v4691_v1 = vld [vmem:[%s6215_s3 + $0xd4] ss:$8 sps:$4 sm:$0xff]  }
  0xbe   : > { %1164 = vmatprep.mubr.bf16.mxu0 %v5203_v0 }
  0xc5   : > { %3930 = vmatmul.mubr.msk.bf16.gmra.mrb[4].mxu0 %vm471_vm2, %v1076_v60  ;;  %v4685_v60 = vld [vmem:[%s6215_s3 + $0xb4] ss:$8 sps:$4 sm:$0xff]  }
 0x181   : > { %v4423_v7 = vpop.f32.mrb[0].mxu1 }
 0x182   : > { %v1207_v8 = vpop.f32.mrb[1].mxu1  ;;  %v1238_v33 = vmax.f32 %v4423_v7, 0.0  ;;  %v4700_v7 = vld [vmem:[%s6215_s3 + $0x104] ss:$8 sps:$4 sm:$0xff]  }
 0x183   : > { %v1232_v9 = vmax.f32 %v1207_v8, 0.0  ;;  %v4424_v10 = vpop.f32.mrb[2].mxu1  ;;  %v4722_v8 = vld [vmem:[%s6216_s4 + $0xc0] ss:$8 sps:$4 sm:$0xff]  }
 0x184   : > { %v1210_v11 = vpop.f32.mrb[3].mxu1  ;;  %v1244_v36 = vpack.c.bf16 %v1238_v33, %v1238_v33  ;;  %v4727_v10 = vld [vmem:[%s6216_s4 + $0xd4] ss:$8 sps:$4 sm:$0xff]  }
 0x185   : > { %v1235_v12 = vmax.f32 %v1210_v11, 0.0  ;;  %v4725_v11 = vld [vmem:[%s6216_s4 + $0xd0] ss:$8 sps:$4 sm:$0xff]   ;;  %v4703_v33 = vld [vmem:[%s6215_s3 + $0x114] ss:$8 sps:$4 sm:$0xff]  }
 0x186   : > { %v1264_v38 = vsel %vm1256_vm5, %v1244_v36, 0 }
 0x187   : > { %v1241_v13 = vpack.c.bf16 %v1235_v12, %v1232_v9  ;;  %v4724_v9 = vld [vmem:[%s6216_s4 + $0xc4] ss:$8 sps:$4 sm:$0xff]  }
 0x188   : > { %1919 = vmatprep.subr.bf16.mxu0 %v4724_v9  ;;  %v4730_v12 = vld [vmem:[%s6216_s4 + $0xe4] ss:$8 sps:$4 sm:$0xff]  }
 0x189   : > { %1920 = vmatpush1.bf16.msra.mxu0 %v4722_v8 }
 0x18a   : > { %1921 = vmatprep.subr.bf16.mxu0 %v4727_v10 }
 0x18d   : > { %1922 = vmatpush1.bf16.msra.mxu0 %v4725_v11 }
 0x18e   : > { %1923 = vmatprep.subr.bf16.mxu0 %v4730_v12 }
 0x190   : > { %v1156_v14 = vpop.f32.mrb[0].mxu0 }
 0x191   : > { %v1158_v15 = vpop.f32.mrb[1].mxu0  ;;  %v1230_v17 = vmax.f32 %v1156_v14, 0.0  ;;  %v4733_v14 = vld [vmem:[%s6216_s4 + $0xf4] ss:$8 sps:$4 sm:$0xff]  }
 0x192   : > { %v1160_v16 = vpop.f32.mrb[2].mxu0  ;;  %v1231_v20 = vmax.f32 %v1158_v15, 0.0  ;;  %v4731_v15 = vld [vmem:[%s6216_s4 + $0xf0] ss:$8 sps:$4 sm:$0xff]  }
 0x193   : > { %v1233_v18 = vmax.f32 %v1160_v16, 0.0  ;;  %v1162_v19 = vpop.f32.mrb[3].mxu0  ;;  %v4736_v16 = vld [vmem:[%s6216_s4 + $0x104] ss:$8 sps:$4 sm:$0xff]  }
 0x194   : > { %v1234_v21 = vmax.f32 %v1162_v19, 0.0  ;;  %v4737_v19 = vld [vmem:[%s6216_s4 + $0x110] ss:$8 sps:$4 sm:$0xff]  }
 0x195   : > { %v1239_v22 = vpack.c.bf16 %v1233_v18, %v1230_v17  ;;  %v4734_v17 = vld [vmem:[%s6216_s4 + $0x100] ss:$8 sps:$4 sm:$0xff]   ;;  %v4739_v18 = vld [vmem:[%s6216_s4 + $0x114] ss:$8 sps:$4 sm:$0xff]  }
 0x196   : > { %v1240_v23 = vpack.c.bf16 %v1234_v21, %v1231_v20  ;;  %v4742_v20 = vld [vmem:[%s6216_s4 + $0x124] ss:$8 sps:$4 sm:$0xff]   ;;  %v4740_v21 = vld [vmem:[%s6216_s4 + $0x120] ss:$8 sps:$4 sm:$0xff]  }
 0x198   : > { %v1166_v24 = vpop.f32.mrb[4].mxu0  ;;  %1266 = vmatprep.subr.bf16.mxu1 %v1240_v23  ;;  %v4743_v23 = vld [vmem:[%s6216_s4 + $0x130] ss:$8 sps:$4 sm:$0xff]  }
 0x199   : > { %v1236_v25 = vmax.f32 %v1166_v24, 0.0  ;;  %v1168_v26 = vpop.f32.mrb[5].mxu0  ;;  %1267 = vmatpush1.bf16.msra.mxu1 %v1239_v22  ;;  %v4745_v22 = vld [vmem:[%s6216_s4 + $0x134] ss:$8 sps:$4 sm:$0xff]   ;;  %v4748_v24 = vld [vmem:[%s6216_s4 + $0x144] ss:$8 sps:$4 sm:$0xff]  }
 0x19a   : > { %v1237_v27 = vmax.f32 %v1168_v26, 0.0  ;;  %v1170_v28 = vpop.f32.mrb[6].mxu0 }
 0x19b   : > { %v1242_v29 = vpack.c.bf16 %v1236_v25, %v1236_v25  ;;  %v1171_v30 = vpop.f32.mrb[7].mxu0  ;;  %v4746_v25 = vld [vmem:[%s6216_s4 + $0x140] ss:$8 sps:$4 sm:$0xff]  }
 0x19c   : > { %v1243_v31 = vpack.c.bf16 %v1237_v27, %v1237_v27 }
 0x19d   : > { %v1258_v32 = vsel %vm1256_vm5, %v1242_v29, 0 }
 0x19e   : > { %3934 = vmatprep.subr.msk.bf16.mxu1 %vm1256_vm5, %v1243_v31 }
 0x19f   : > { %1269 = vmatpush1.bf16.msra.mxu1 %v1258_v32  ;;  %v4698_v32 = vld [vmem:[%s6215_s3 + $0x100] ss:$8 sps:$4 sm:$0xff]  }
 0x1a0   : > { %4425 = vmatprep.subr.bf16.mxu1 %v5204_v35 }
 0x1a2   : > { %3935 = vmatmul.mubr.msk.bf16.vlgmr.msra.gmra.mrb[4].mxu1 %vm1252_vm6, %v4649_v34 }
 0x1a3   : > { %4426 = vmatpush3.bf16.msra.mxu1 %v1241_v13  ;;  %4429 = vmatprep.mubr.msk.bf16.mxu1 %vm5205_vm7, %v5204_v35  ;;  %v4728_v13 = vld [vmem:[%s6216_s4 + $0xe0] ss:$8 sps:$4 sm:$0xff]  }
 0x1a4   : > { %4427 = vmatprep.subr.bf16.mxu1 %v5204_v35  ;;  %1924 = vmatpush1.bf16.msra.mxu0 %v4728_v13 }
 0x1a5   : > { %1925 = vmatprep.subr.bf16.mxu0 %v4733_v14 }
 0x1a7   : > { %4428 = vmatpush3.bf16.msra.mxu1 %v1264_v38 }
 0x1a8   : > { %1641 = vmatprep.subr.bf16.mxu1 %v4652_v37  ;;  %1926 = vmatpush1.bf16.msra.mxu0 %v4731_v15  ;;  %v4706_v37 = vld [vmem:[%s6215_s3 + $0x124] ss:$8 sps:$4 sm:$0xff]   ;;  %v4758_v15 = vld [vmem:[%s6216_s4] ss:$8 sps:$4 sm:$0xff]  }
 0x1a9   : > { %1927 = vmatprep.subr.bf16.mxu0 %v4736_v16 }
 0x1aa   : > { %4430 = vmatmul.mubr.msk.bf16.vlgmr.msra.gmra.mrb[8].mxu1 %vm1252_vm6, %v4649_v34  ;;  %v4701_v34 = vld [vmem:[%s6215_s3 + $0x110] ss:$8 sps:$4 sm:$0xff]  }
 0x1ab   : > { %1642 = vmatpush1.bf16.msra.mxu1 %v4650_v39 }
 0x1ac   : > { %1643 = vmatprep.subr.bf16.mxu1 %v4655_v40  ;;  %1928 = vmatpush1.bf16.msra.mxu0 %v4734_v17 }
 0x1ad   : > { %1929 = vmatprep.subr.bf16.mxu0 %v4739_v18  ;;  %v4763_v18 = vld [vmem:[%s6216_s4 + $0x14] ss:$8 sps:$4 sm:$0xff]  }
 0x1af   : > { %1644 = vmatpush1.bf16.msra.mxu1 %v4653_v41 }
 0x1b0   : > { %1645 = vmatprep.subr.bf16.mxu1 %v4658_v42  ;;  %1930 = vmatpush1.bf16.msra.mxu0 %v4737_v19  ;;  %v4704_v42 = vld [vmem:[%s6215_s3 + $0x120] ss:$8 sps:$4 sm:$0xff]  }
 0x1b1   : > { %1931 = vmatprep.subr.bf16.mxu0 %v4742_v20  ;;  %v4761_v20 = vld [vmem:[%s6216_s4 + $0x10] ss:$8 sps:$4 sm:$0xff]  }
 0x1b3   : > { %1646 = vmatpush1.bf16.msra.mxu1 %v4656_v43  ;;  %v4709_v43 = vld [vmem:[%s6215_s3 + $0x134] ss:$8 sps:$4 sm:$0xff]  }
 0x1b4   : > { %1647 = vmatprep.subr.bf16.mxu1 %v4661_v44  ;;  %1932 = vmatpush1.bf16.msra.mxu0 %v4740_v21  ;;  %v4707_v44 = vld [vmem:[%s6215_s3 + $0x130] ss:$8 sps:$4 sm:$0xff]   ;;  %v4766_v21 = vld [vmem:[%s6216_s4 + $0x24] ss:$8 sps:$4 sm:$0xff]  }
 0x1b5   : > { %1933 = vmatprep.subr.bf16.mxu0 %v4745_v22  ;;  %v4764_v22 = vld [vmem:[%s6216_s4 + $0x20] ss:$8 sps:$4 sm:$0xff]  }
 0x1b7   : > { %1648 = vmatpush1.bf16.msra.mxu1 %v4659_v45  ;;  %v4712_v45 = vld [vmem:[%s6215_s3 + $0x144] ss:$8 sps:$4 sm:$0xff]  }
 0x1b8   : > { %1649 = vmatprep.subr.bf16.mxu1 %v4664_v46  ;;  %1934 = vmatpush1.bf16.msra.mxu0 %v4743_v23  ;;  %v4710_v46 = vld [vmem:[%s6215_s3 + $0x140] ss:$8 sps:$4 sm:$0xff]   ;;  %v4769_v23 = vld [vmem:[%s6216_s4 + $0x34] ss:$8 sps:$4 sm:$0xff]  }
 0x1b9   : > { %1935 = vmatprep.subr.bf16.mxu0 %v4748_v24  ;;  %v4767_v24 = vld [vmem:[%s6216_s4 + $0x30] ss:$8 sps:$4 sm:$0xff]  }
 0x1bb   : > { %1650 = vmatpush1.bf16.msra.mxu1 %v4662_v47  ;;  %v4715_v47 = vld [vmem:[%s6215_s3 + $0x154] ss:$8 sps:$4 sm:$0xff]  }
 0x1bc   : > { %1651 = vmatprep.subr.bf16.mxu1 %v4667_v48  ;;  %1936 = vmatpush1.bf16.msra.mxu0 %v4746_v25  ;;  %v4713_v48 = vld [vmem:[%s6215_s3 + $0x150] ss:$8 sps:$4 sm:$0xff]   ;;  %v4772_v25 = vld [vmem:[%s6216_s4 + $0x44] ss:$8 sps:$4 sm:$0xff]  }
 0x1bf   : > { %1652 = vmatpush1.bf16.msra.mxu1 %v4665_v49  ;;  %v4718_v49 = vld [vmem:[%s6215_s3 + $0x164] ss:$8 sps:$4 sm:$0xff]  }
 0x1c0   : > { %1653 = vmatprep.subr.bf16.mxu1 %v4670_v50  ;;  %v4716_v50 = vld [vmem:[%s6215_s3 + $0x160] ss:$8 sps:$4 sm:$0xff]  }
 0x1c3   : > { %1654 = vmatpush1.bf16.msra.mxu1 %v4668_v51  ;;  %v4721_v51 = vld [vmem:[%s6215_s3 + $0x174] ss:$8 sps:$4 sm:$0xff]  }
 0x1c4   : > { %1655 = vmatprep.subr.bf16.mxu1 %v4673_v52  ;;  %v4719_v52 = vld [vmem:[%s6215_s3 + $0x170] ss:$8 sps:$4 sm:$0xff]  }
 0x1c7   : > { %1656 = vmatpush1.bf16.msra.mxu1 %v4671_v53  ;;  %v4751_v53 = vld [vmem:[%s6216_s4 + $0x154] ss:$8 sps:$4 sm:$0xff]  }
 0x1c8   : > { %1657 = vmatprep.subr.bf16.mxu1 %v4676_v54  ;;  %v4749_v54 = vld [vmem:[%s6216_s4 + $0x150] ss:$8 sps:$4 sm:$0xff]   ;;  %1937 = vmatprep.subr.bf16.mxu0 %v4751_v53  ;;  %v4806_v53 = vld [vmem:[%s6216_s4 + $0x1c0] ss:$8 sps:$4 sm:$0xff]  }
 0x1c9   : > { %1938 = vmatpush1.bf16.msra.mxu0 %v4749_v54  ;;  %v4811_v54 = vld [vmem:[%s6216_s4 + $0x1d4] ss:$8 sps:$4 sm:$0xff]  }
 0x1cb   : > { %1658 = vmatpush1.bf16.msra.mxu1 %v4674_v55  ;;  %v4754_v55 = vld [vmem:[%s6216_s4 + $0x164] ss:$8 sps:$4 sm:$0xff]  }
 0x1cc   : > { %1659 = vmatprep.subr.bf16.mxu1 %v4679_v56  ;;  %v4752_v56 = vld [vmem:[%s6216_s4 + $0x160] ss:$8 sps:$4 sm:$0xff]   ;;  %1939 = vmatprep.subr.bf16.mxu0 %v4754_v55  ;;  %v4809_v55 = vld [vmem:[%s6216_s4 + $0x1d0] ss:$8 sps:$4 sm:$0xff]  }
 0x1cd   : > { %1940 = vmatpush1.bf16.msra.mxu0 %v4752_v56  ;;  %v4814_v56 = vld [vmem:[%s6216_s4 + $0x1e4] ss:$8 sps:$4 sm:$0xff]  }
 0x1cf   : > { %1660 = vmatpush1.bf16.msra.mxu1 %v4677_v57  ;;  %v4757_v57 = vld [vmem:[%s6216_s4 + $0x174] ss:$8 sps:$4 sm:$0xff]  }
 0x1d0   : > { %1661 = vmatprep.subr.bf16.mxu1 %v4682_v58  ;;  %v4755_v58 = vld [vmem:[%s6216_s4 + $0x170] ss:$8 sps:$4 sm:$0xff]   ;;  %1941 = vmatprep.subr.bf16.mxu0 %v4757_v57  ;;  %v4812_v57 = vld [vmem:[%s6216_s4 + $0x1e0] ss:$8 sps:$4 sm:$0xff]  }
 0x1d1   : > { %1942 = vmatpush1.bf16.msra.mxu0 %v4755_v58  ;;  %v4817_v58 = vld [vmem:[%s6216_s4 + $0x1f4] ss:$8 sps:$4 sm:$0xff]  }
 0x1d3   : > { %1662 = vmatpush1.bf16.msra.mxu1 %v4680_v59  ;;  %v4760_v59 = vld [vmem:[%s6216_s4 + $0x4] ss:$8 sps:$4 sm:$0xff]  }
 0x1d4   : > { %1663 = vmatprep.subr.bf16.mxu1 %v4685_v60  ;;  %2083 = vmatprep.subr.bf16.mxu0 %v4760_v59  ;;  %v4815_v59 = vld [vmem:[%s6216_s4 + $0x1f0] ss:$8 sps:$4 sm:$0xff]  }
 0x1d7   : > { %1664 = vmatpush1.bf16.msra.mxu1 %v4683_v61 }
 0x1d8   : > { %1665 = vmatprep.subr.bf16.mxu1 %v4688_v62 }
 0x1db   : > { %1666 = vmatpush1.bf16.msra.mxu1 %v4686_v63 }
 0x1dc   : > { %1667 = vmatprep.subr.bf16.mxu1 %v4691_v1 }
 0x1df   : > { %1668 = vmatpush1.bf16.msra.mxu1 %v4689_v2 }
 0x1e0   : > { %1669 = vmatprep.subr.bf16.mxu1 %v4694_v3 }
 0x1e3   : > { %1670 = vmatpush1.bf16.msra.mxu1 %v4692_v4 }
 0x1e4   : > { %1671 = vmatprep.subr.bf16.mxu1 %v4697_v5 }
 0x1e7   : > { %1672 = vmatpush1.bf16.msra.mxu1 %v4695_v6 }
 0x1e8   : > { %1684 = vmatprep.subr.bf16.mxu1 %v4700_v7 }
 0x275   : > { %v1300_v26 = vpop.f32.mrb[4].mxu1 }
 0x276   : > { %v1302_v27 = vpop.f32.mrb[5].mxu1 }
 0x277   : > { %v1304_v28 = vpop.f32.mrb[6].mxu1 }
 0x278   : > { %v1350_v29 = vpack.c.bf16 %v1304_v28, %v1300_v26  ;;  %v1306_v30 = vpop.f32.mrb[7].mxu1  ;;  %v4770_v26 = vld [vmem:[%s6216_s4 + $0x40] ss:$8 sps:$4 sm:$0xff]   ;;  %v4773_v28 = vld [vmem:[%s6216_s4 + $0x50] ss:$8 sps:$4 sm:$0xff]  }
 0x279   : > { %v1351_v31 = vpack.c.bf16 %v1306_v30, %v1302_v27  ;;  %v4775_v27 = vld [vmem:[%s6216_s4 + $0x54] ss:$8 sps:$4 sm:$0xff]   ;;  %v4776_v30 = vld [vmem:[%s6216_s4 + $0x60] ss:$8 sps:$4 sm:$0xff]  }
 0x27b   : > { %1673 = vmatprep.mubr.bf16.mxu1 %v1351_v31  ;;  %v4781_v31 = vld [vmem:[%s6216_s4 + $0x74] ss:$8 sps:$4 sm:$0xff]  }
 0x27c   : > { %1674 = vmatmul.mubr.bf16.vlgmr.msra.gmra.mrb[12].mxu1 %v1350_v29  ;;  %v4778_v29 = vld [vmem:[%s6216_s4 + $0x64] ss:$8 sps:$4 sm:$0xff]  }
 0x27d   : > { %1685 = vmatpush1.bf16.msra.mxu1 %v4698_v32  ;;  %v1343_v36 = vpop.f32.mrb[8].mxu1  ;;  %1716 = vmatprep.mubr.bf16.mxu1 %v5203_v0  ;;  %v4779_v32 = vld [vmem:[%s6216_s4 + $0x70] ss:$8 sps:$4 sm:$0xff]  }
 0x27e   : > { %1686 = vmatprep.subr.bf16.mxu1 %v4703_v33  ;;  %v4431_v38 = vpop.f32.mrb[9].mxu1  ;;  %v4784_v33 = vld [vmem:[%s6216_s4 + $0x84] ss:$8 sps:$4 sm:$0xff]  }
 0x27f   : > { %v1346_v39 = vpop.f32.mrb[10].mxu1  ;;  %v4790_v38 = vld [vmem:[%s6216_s4 + $0xa4] ss:$8 sps:$4 sm:$0xff]  }
 0x280   : > { %v1352_v40 = vpack.c.bf16 %v1346_v39, %v1343_v36  ;;  %v4432_v41 = vpop.f32.mrb[11].mxu1  ;;  %v4787_v36 = vld [vmem:[%s6216_s4 + $0x94] ss:$8 sps:$4 sm:$0xff]   ;;  %v4788_v39 = vld [vmem:[%s6216_s4 + $0xa0] ss:$8 sps:$4 sm:$0xff]  }
 0x281   : > { %1687 = vmatpush1.bf16.msra.mxu1 %v4701_v34  ;;  %v4782_v34 = vld [vmem:[%s6216_s4 + $0x80] ss:$8 sps:$4 sm:$0xff]   ;;  %v4791_v41 = vld [vmem:[%s6216_s4 + $0xb0] ss:$8 sps:$4 sm:$0xff]  }
 0x282   : > { %1688 = vmatprep.subr.bf16.mxu1 %v4706_v37  ;;  %v4785_v37 = vld [vmem:[%s6216_s4 + $0x90] ss:$8 sps:$4 sm:$0xff]  }
 0x285   : > { %1689 = vmatpush1.bf16.msra.mxu1 %v4704_v42  ;;  %v4796_v42 = vld [vmem:[%s6216_s4 + $0x184] ss:$8 sps:$4 sm:$0xff]  }
 0x286   : > { %1690 = vmatprep.subr.bf16.mxu1 %v4709_v43  ;;  %v4794_v43 = vld [vmem:[%s6216_s4 + $0x180] ss:$8 sps:$4 sm:$0xff]  }
 0x289   : > { %1691 = vmatpush1.bf16.msra.mxu1 %v4707_v44 }
 0x28a   : > { %1692 = vmatprep.subr.bf16.mxu1 %v4712_v45  ;;  %v4799_v45 = vld [vmem:[%s6216_s4 + $0x194] ss:$8 sps:$4 sm:$0xff]  }
 0x28d   : > { %1693 = vmatpush1.bf16.msra.mxu1 %v4710_v46 }
 0x28e   : > { %1694 = vmatprep.subr.bf16.mxu1 %v4715_v47  ;;  %v4797_v47 = vld [vmem:[%s6216_s4 + $0x190] ss:$8 sps:$4 sm:$0xff]  }
 0x291   : > { %1695 = vmatpush1.bf16.msra.mxu1 %v4713_v48  ;;  %v4802_v48 = vld [vmem:[%s6216_s4 + $0x1a4] ss:$8 sps:$4 sm:$0xff]  }
 0x292   : > { %1696 = vmatprep.subr.bf16.mxu1 %v4718_v49  ;;  %v4800_v49 = vld [vmem:[%s6216_s4 + $0x1a0] ss:$8 sps:$4 sm:$0xff]  }
 0x295   : > { %1697 = vmatpush1.bf16.msra.mxu1 %v4716_v50  ;;  %v4805_v50 = vld [vmem:[%s6216_s4 + $0x1b4] ss:$8 sps:$4 sm:$0xff]  }
 0x296   : > { %1698 = vmatprep.subr.bf16.mxu1 %v4721_v51  ;;  %v4803_v51 = vld [vmem:[%s6216_s4 + $0x1b0] ss:$8 sps:$4 sm:$0xff]  }
 0x299   : > { %1699 = vmatpush1.bf16.msra.mxu1 %v4719_v52  ;;  %v4808_v52 = vld [vmem:[%s6216_s4 + $0x1c4] ss:$8 sps:$4 sm:$0xff]  }
 0x29c   : > { %1717 = vmatmul.mubr.bf16.vlgmr.msra.gmra.mrb[12].mxu1 %v1352_v40  ;;  %v4793_v40 = vld [vmem:[%s6216_s4 + $0xb4] ss:$8 sps:$4 sm:$0xff]  }
 0x29d   : > { %2759 = vmatprep.mubr.bf16.mxu1 %v5203_v0 }
 0x36f   : > { %v5704_v60 = vpop.f32.mrb[12].mxu1 }
 0x370   : > { %v1720_v61 = vpop.f32.mrb[13].mxu1  ;;  %v1727_v44 = vpack.c.bf16 %v5704_v60, %v5704_v60 }
 0x371   : > { %v1722_v62 = vpop.f32.mrb[14].mxu1  ;;  %v1728_v19 = vpack.c.bf16 %v1720_v61, %v1720_v61 }
 0x372   : > { %v5707_v63 = vpack.c.bf16 %v1722_v62, %v5704_v60  ;;  %v1724_v1 = vpop.f32.mrb[15].mxu1  ;;  %v4820_v60 = vld [vmem:[%s6216_s4 + $0x204] ss:$8 sps:$4 sm:$0xff]   ;;  %v4823_v62 = vld [vmem:[%s6216_s4 + $0x214] ss:$8 sps:$4 sm:$0xff]  }
 0x373   : > { %v5709_v2 = vpack.c.bf16 %v1724_v1, %v1720_v61  ;;  %v4818_v61 = vld [vmem:[%s6216_s4 + $0x200] ss:$8 sps:$4 sm:$0xff]   ;;  %v4821_v1 = vld [vmem:[%s6216_s4 + $0x210] ss:$8 sps:$4 sm:$0xff]  }
 0x374   : > { %v1781_v3 = vshrl.u32 %v5707_v63, 16  ;;  %v1783_v4 = vshll.u32 %v5707_v63, 16 }
 0x375   : > { %v1788_v5 = vshrl.u32 %v5709_v2, 16  ;;  %v1790_v6 = vshll.u32 %v5709_v2, 16  ;;  %v2152_v46 = vrot.slane %v5709_v2, 1 }
 0x376   : > { %v1785_v7 = vrot.slane %v1783_v4, 1  ;;  %v5715_v8 = vrot.slane %v1781_v3, 1  ;;  %v5717_v9 = vrot.slane %v1783_v4, 2  ;;  %v4824_v4 = vld [vmem:[%s6216_s4 + $0x220] ss:$8 sps:$4 sm:$0xff]  }
 0x377   : > { %v1792_v10 = vrot.slane %v1790_v6, 1  ;;  %v5719_v11 = vrot.slane %v1788_v5, 1  ;;  %v5721_v12 = vrot.slane %v1790_v6, 2  ;;  %v4827_v6 = vld [vmem:[%s6216_s4 + $0x230] ss:$8 sps:$4 sm:$0xff]  }
 0x378   : > { %v2347_v13 = vor.u32 %v5717_v9, %v5715_v8  ;;  %v1786_v17 = vor.u32 %v1785_v7, %v1781_v3  ;;  %v4826_v3 = vld [vmem:[%s6216_s4 + $0x224] ss:$8 sps:$4 sm:$0xff]   ;;  %v4877_v8 = vld [vmem:[%s6216_s4 + $0x334] ss:$8 sps:$4 sm:$0xff]   ;;  %v4875_v9 = vld [vmem:[%s6216_s4 + $0x330] ss:$8 sps:$4 sm:$0xff]  }
 0x379   : > { %v1793_v14 = vor.u32 %v1792_v10, %v1788_v5  ;;  %v2350_v16 = vor.u32 %v5721_v12, %v5719_v11  ;;  %v4829_v5 = vld [vmem:[%s6216_s4 + $0x234] ss:$8 sps:$4 sm:$0xff]   ;;  %v4832_v7 = vld [vmem:[%s6216_s4 + $0x244] ss:$8 sps:$4 sm:$0xff]   ;;  %v4830_v10 = vld [vmem:[%s6216_s4 + $0x240] ss:$8 sps:$4 sm:$0xff]  }
 0x37a   : > { %v4841_v11 = vld [vmem:[%s6216_s4 + $0x274] ss:$8 sps:$4 sm:$0xff]   ;;  %v4839_v12 = vld [vmem:[%s6216_s4 + $0x270] ss:$8 sps:$4 sm:$0xff]  }
 0x37b   : > { %4033 = vmatprep.mubr.msk.bf16.mxu0 %vm1915_vm8, %v1793_v14  ;;  %v2151_v14 = vrot.slane %v5707_v63, 1 }
 0x37c   : > { %1952 = vmatmul.mubr.bf16.vlgmr.msra.gmra.mrb[8].mxu0 %v1786_v17  ;;  %v4833_v17 = vld [vmem:[%s6216_s4 + $0x250] ss:$8 sps:$4 sm:$0xff]  }
 0x37d   : > { %2084 = vmatpush1.bf16.msra.mxu0 %v4758_v15  ;;  %4058 = vmatprep.mubr.msk.bf16.mxu0 %vm1915_vm8, %v1728_v19  ;;  %v4835_v15 = vld [vmem:[%s6216_s4 + $0x254] ss:$8 sps:$4 sm:$0xff]   ;;  %v4836_v19 = vld [vmem:[%s6216_s4 + $0x260] ss:$8 sps:$4 sm:$0xff]  }
 0x37e   : > { %2085 = vmatprep.subr.bf16.mxu0 %v4763_v18  ;;  %v4838_v18 = vld [vmem:[%s6216_s4 + $0x264] ss:$8 sps:$4 sm:$0xff]  }
 0x381   : > { %2086 = vmatpush1.bf16.msra.mxu0 %v4761_v20  ;;  %v4842_v20 = vld [vmem:[%s6216_s4 + $0x280] ss:$8 sps:$4 sm:$0xff]  }
 0x382   : > { %2087 = vmatprep.subr.bf16.mxu0 %v4766_v21  ;;  %v4847_v21 = vld [vmem:[%s6216_s4 + $0x294] ss:$8 sps:$4 sm:$0xff]  }
 0x385   : > { %2088 = vmatpush1.bf16.msra.mxu0 %v4764_v22  ;;  %v4845_v22 = vld [vmem:[%s6216_s4 + $0x290] ss:$8 sps:$4 sm:$0xff]  }
 0x386   : > { %2089 = vmatprep.subr.bf16.mxu0 %v4769_v23  ;;  %v4850_v23 = vld [vmem:[%s6216_s4 + $0x2a4] ss:$8 sps:$4 sm:$0xff]  }
 0x389   : > { %2090 = vmatpush1.bf16.msra.mxu0 %v4767_v24  ;;  %v4848_v24 = vld [vmem:[%s6216_s4 + $0x2a0] ss:$8 sps:$4 sm:$0xff]  }
 0x38a   : > { %2091 = vmatprep.subr.bf16.mxu0 %v4772_v25  ;;  %v4853_v25 = vld [vmem:[%s6216_s4 + $0x2b4] ss:$8 sps:$4 sm:$0xff]  }
 0x38d   : > { %2092 = vmatpush1.bf16.msra.mxu0 %v4770_v26  ;;  %v4851_v26 = vld [vmem:[%s6216_s4 + $0x2b0] ss:$8 sps:$4 sm:$0xff]  }
 0x38e   : > { %2093 = vmatprep.subr.bf16.mxu0 %v4775_v27  ;;  %v4856_v27 = vld [vmem:[%s6216_s4 + $0x2c4] ss:$8 sps:$4 sm:$0xff]  }
 0x391   : > { %2094 = vmatpush1.bf16.msra.mxu0 %v4773_v28  ;;  %v4854_v28 = vld [vmem:[%s6216_s4 + $0x2c0] ss:$8 sps:$4 sm:$0xff]  }
 0x392   : > { %2095 = vmatprep.subr.bf16.mxu0 %v4778_v29  ;;  %v4859_v29 = vld [vmem:[%s6216_s4 + $0x2d4] ss:$8 sps:$4 sm:$0xff]  }
 0x395   : > { %2096 = vmatpush1.bf16.msra.mxu0 %v4776_v30  ;;  %v4857_v30 = vld [vmem:[%s6216_s4 + $0x2d0] ss:$8 sps:$4 sm:$0xff]  }
 0x396   : > { %2097 = vmatprep.subr.bf16.mxu0 %v4781_v31  ;;  %v4862_v31 = vld [vmem:[%s6216_s4 + $0x2e4] ss:$8 sps:$4 sm:$0xff]  }
 0x399   : > { %2098 = vmatpush1.bf16.msra.mxu0 %v4779_v32  ;;  %v4860_v32 = vld [vmem:[%s6216_s4 + $0x2e0] ss:$8 sps:$4 sm:$0xff]  }
 0x39a   : > { %2099 = vmatprep.subr.bf16.mxu0 %v4784_v33  ;;  %v4865_v33 = vld [vmem:[%s6216_s4 + $0x2f4] ss:$8 sps:$4 sm:$0xff]  }
 0x39d   : > { %2100 = vmatpush1.bf16.msra.mxu0 %v4782_v34  ;;  %v4863_v34 = vld [vmem:[%s6216_s4 + $0x2f0] ss:$8 sps:$4 sm:$0xff]  }
 0x39e   : > { %2101 = vmatprep.subr.bf16.mxu0 %v4787_v36  ;;  %v4868_v36 = vld [vmem:[%s6216_s4 + $0x304] ss:$8 sps:$4 sm:$0xff]  }
 0x3a1   : > { %2102 = vmatpush1.bf16.msra.mxu0 %v4785_v37  ;;  %v4866_v37 = vld [vmem:[%s6216_s4 + $0x300] ss:$8 sps:$4 sm:$0xff]  }
 0x3a2   : > { %2103 = vmatprep.subr.bf16.mxu0 %v4790_v38  ;;  %v4871_v38 = vld [vmem:[%s6216_s4 + $0x314] ss:$8 sps:$4 sm:$0xff]  }
 0x3a5   : > { %2104 = vmatpush1.bf16.msra.mxu0 %v4788_v39  ;;  %v2544_v39 = vrot.slane %v5709_v2, 2  ;;  %v4872_v2 = vld [vmem:[%s6216_s4 + $0x320] ss:$8 sps:$4 sm:$0xff]  }
 0x3a6   : > { %2105 = vmatprep.subr.bf16.mxu0 %v4793_v40  ;;  %v4869_v40 = vld [vmem:[%s6216_s4 + $0x310] ss:$8 sps:$4 sm:$0xff]  }
 0x3a9   : > { %2106 = vmatpush1.bf16.msra.mxu0 %v4791_v41  ;;  %v4874_v41 = vld [vmem:[%s6216_s4 + $0x324] ss:$8 sps:$4 sm:$0xff]  }
 0x3aa   : > { %2277 = vmatprep.subr.bf16.mxu0 %v4796_v42  ;;  %v4878_v42 = vld [vmem:[%s6216_s4 + $0x340] ss:$8 sps:$4 sm:$0xff]  }
 0x3ac   : > { %2116 = vmatmul.mubr.bf16.vlgmr.msra.gmra.mrb[8].mxu0 %v1727_v44  ;;  %v4881_v44 = vld [vmem:[%s6216_s4 + $0x350] ss:$8 sps:$4 sm:$0xff]  }
 0x3ad   : > { %2278 = vmatpush1.bf16.msra.mxu0 %v4794_v43  ;;  %4107 = vmatprep.mubr.msk.bf16.mxu0 %vm1915_vm8, %v2152_v46  ;;  %v4883_v43 = vld [vmem:[%s6216_s4 + $0x354] ss:$8 sps:$4 sm:$0xff]   ;;  %v4884_v46 = vld [vmem:[%s6216_s4 + $0x360] ss:$8 sps:$4 sm:$0xff]  }
 0x3ae   : > { %2279 = vmatprep.subr.bf16.mxu0 %v4799_v45  ;;  %v4886_v45 = vld [vmem:[%s6216_s4 + $0x364] ss:$8 sps:$4 sm:$0xff]  }
 0x3b1   : > { %2280 = vmatpush1.bf16.msra.mxu0 %v4797_v47  ;;  %v4889_v47 = vld [vmem:[%s6216_s4 + $0x374] ss:$8 sps:$4 sm:$0xff]  }
 0x3b2   : > { %2281 = vmatprep.subr.bf16.mxu0 %v4802_v48  ;;  %v4887_v48 = vld [vmem:[%s6216_s4 + $0x370] ss:$8 sps:$4 sm:$0xff]  }
 0x3b5   : > { %2282 = vmatpush1.bf16.msra.mxu0 %v4800_v49  ;;  %v4892_v49 = vld [vmem:[%s6216_s4 + $0x384] ss:$8 sps:$4 sm:$0xff]  }
 0x3b6   : > { %2283 = vmatprep.subr.bf16.mxu0 %v4805_v50  ;;  %v4890_v50 = vld [vmem:[%s6216_s4 + $0x380] ss:$8 sps:$4 sm:$0xff]  }
 0x3b9   : > { %2284 = vmatpush1.bf16.msra.mxu0 %v4803_v51  ;;  %v4895_v51 = vld [vmem:[%s6216_s4 + $0x394] ss:$8 sps:$4 sm:$0xff]  }
 0x3ba   : > { %2285 = vmatprep.subr.bf16.mxu0 %v4808_v52  ;;  %v4893_v52 = vld [vmem:[%s6216_s4 + $0x390] ss:$8 sps:$4 sm:$0xff]  }
 0x3bd   : > { %2286 = vmatpush1.bf16.msra.mxu0 %v4806_v53  ;;  %v4898_v53 = vld [vmem:[%s6216_s4 + $0x3a4] ss:$8 sps:$4 sm:$0xff]  }
 0x3be   : > { %2287 = vmatprep.subr.bf16.mxu0 %v4811_v54  ;;  %v4896_v54 = vld [vmem:[%s6216_s4 + $0x3a0] ss:$8 sps:$4 sm:$0xff]  }
 0x3c1   : > { %2288 = vmatpush1.bf16.msra.mxu0 %v4809_v55  ;;  %v4901_v55 = vld [vmem:[%s6216_s4 + $0x3b4] ss:$8 sps:$4 sm:$0xff]  }
 0x3c2   : > { %2289 = vmatprep.subr.bf16.mxu0 %v4814_v56  ;;  %v4899_v56 = vld [vmem:[%s6216_s4 + $0x3b0] ss:$8 sps:$4 sm:$0xff]  }
 0x3c5   : > { %2290 = vmatpush1.bf16.msra.mxu0 %v4812_v57  ;;  %v2543_v57 = vrot.slane %v5707_v63, 2  ;;  %v2716_v63 = vld [vmem:[%s6217_s5] sm:$0x3] }
 0x3c6   : > { %2291 = vmatprep.subr.bf16.mxu0 %v4817_v58 }
 0x3c9   : > { %2292 = vmatpush1.bf16.msra.mxu0 %v4815_v59 }
 0x3ca   : > { %2293 = vmatprep.subr.bf16.mxu0 %v4820_v60 }
 0x3cd   : > { %2294 = vmatpush1.bf16.msra.mxu0 %v4818_v61 }
 0x3ce   : > { %2295 = vmatprep.subr.bf16.mxu0 %v4823_v62 }
 0x3d1   : > { %2296 = vmatpush1.bf16.msra.mxu0 %v4821_v1 }
 0x3d2   : > { %2297 = vmatprep.subr.bf16.mxu0 %v4826_v3 }
 0x3d5   : > { %2298 = vmatpush1.bf16.msra.mxu0 %v4824_v4 }
 0x3d6   : > { %2299 = vmatprep.subr.bf16.mxu0 %v4829_v5  ;;  %v4902_v5 = vld [vmem:[%s6218_s6 + $0x40] sm:$0xff]  }
 0x3d9   : > { %2300 = vmatpush1.bf16.msra.mxu0 %v4827_v6 }
 0x3da   : > { %2475 = vmatprep.subr.bf16.mxu0 %v4832_v7  ;;  %v4903_v7 = vld [vmem:[%s6218_s6] sm:$0xff]  }
 0x3dc   : > { %2310 = vmatmul.mubr.bf16.vlgmr.msra.gmra.mrb[8].mxu0 %v2151_v14  ;;  %v4905_v14 = vld [vmem:[%s6218_s6 + $0x8] sm:$0xff]  }
 0x3dd   : > { %2476 = vmatpush1.bf16.msra.mxu0 %v4830_v10  ;;  %4156 = vmatprep.mubr.msk.bf16.mxu0 %vm1915_vm8, %v2350_v16  ;;  %v4844_v16 = vld [vmem:[%s6216_s4 + $0x284] ss:$8 sps:$4 sm:$0xff]  }
 0x3de   : > { %2477 = vmatprep.subr.bf16.mxu0 %v4835_v15  ;;  %v4904_v10 = vld [vmem:[%s6218_s6 + $0x48] sm:$0xff]   ;;  %v4906_v15 = vld [vmem:[%s6218_s6 + $0x50] sm:$0xff]  }
 0x3e1   : > { %2478 = vmatpush1.bf16.msra.mxu0 %v4833_v17  ;;  %v4907_v17 = vld [vmem:[%s6218_s6 + $0x10] sm:$0xff]  }
 0x3e2   : > { %2479 = vmatprep.subr.bf16.mxu0 %v4838_v18  ;;  %v4908_v18 = vld [vmem:[%s6218_s6 + $0x58] sm:$0xff]  }
 0x3e5   : > { %2480 = vmatpush1.bf16.msra.mxu0 %v4836_v19  ;;  %v4909_v19 = vld [vmem:[%s6218_s6 + $0x18] sm:$0xff]  }
 0x3e6   : > { %2481 = vmatprep.subr.bf16.mxu0 %v4841_v11  ;;  %v4910_v11 = vld [vmem:[%s6218_s6 + $0x60] sm:$0xff]  }
 0x3e9   : > { %2482 = vmatpush1.bf16.msra.mxu0 %v4839_v12  ;;  %v4911_v12 = vld [vmem:[%s6218_s6 + $0x20] sm:$0xff]  }
 0x3ea   : > { %2483 = vmatprep.subr.bf16.mxu0 %v4844_v16  ;;  %v4912_v16 = vld [vmem:[%s6218_s6 + $0x68] sm:$0xff]  }
 0x3ed   : > { %2484 = vmatpush1.bf16.msra.mxu0 %v4842_v20  ;;  %v4913_v20 = vld [vmem:[%s6218_s6 + $0x28] sm:$0xff]  }
 0x3ee   : > { %2485 = vmatprep.subr.bf16.mxu0 %v4847_v21  ;;  %v4914_v21 = vld [vmem:[%s6218_s6 + $0x70] sm:$0xff]  }
 0x3f1   : > { %2486 = vmatpush1.bf16.msra.mxu0 %v4845_v22  ;;  %v4915_v22 = vld [vmem:[%s6218_s6 + $0x30] sm:$0xff]  }
 0x3f2   : > { %2487 = vmatprep.subr.bf16.mxu0 %v4850_v23  ;;  %v4916_v23 = vld [vmem:[%s6218_s6 + $0x78] sm:$0xff]  }
 0x3f5   : > { %2488 = vmatpush1.bf16.msra.mxu0 %v4848_v24  ;;  %v4917_v24 = vld [vmem:[%s6218_s6 + $0x38] sm:$0xff]  }
 0x3f6   : > { %2489 = vmatprep.subr.bf16.mxu0 %v4853_v25  ;;  %v4920_v25 = vld [vmem:[#allocation7 + $0x84] ss:$8 sps:$4 sm:$0xff]  }
 0x3f9   : > { %2490 = vmatpush1.bf16.msra.mxu0 %v4851_v26 }
 0x3fa   : > { %2491 = vmatprep.subr.bf16.mxu0 %v4856_v27 }
 0x3fd   : > { %2492 = vmatpush1.bf16.msra.mxu0 %v4854_v28 }
 0x3fe   : > { %2493 = vmatprep.subr.bf16.mxu0 %v4859_v29 }
 0x401   : > { %2494 = vmatpush1.bf16.msra.mxu0 %v4857_v30  ;;  %v4918_v30 = vld [vmem:[#allocation7 + $0x80] ss:$8 sps:$4 sm:$0xff]  }
 0x402   : > { %2495 = vmatprep.subr.bf16.mxu0 %v4862_v31 }
 0x405   : > { %2496 = vmatpush1.bf16.msra.mxu0 %v4860_v32 }
 0x406   : > { %2497 = vmatprep.subr.bf16.mxu0 %v4865_v33  ;;  %v4923_v33 = vld [vmem:[#allocation7 + $0x94] ss:$8 sps:$4 sm:$0xff]  }
 0x409   : > { %2498 = vmatpush1.bf16.msra.mxu0 %v4863_v34  ;;  %v4921_v34 = vld [vmem:[#allocation7 + $0x90] ss:$8 sps:$4 sm:$0xff]  }
 0x40a   : > { %2669 = vmatprep.subr.bf16.mxu0 %v4868_v36  ;;  %v4926_v36 = vld [vmem:[#allocation7 + $0xa4] ss:$8 sps:$4 sm:$0xff]  }
 0x40c   : > { %2508 = vmatmul.mubr.bf16.vlgmr.msra.gmra.mrb[8].mxu0 %v2347_v13  ;;  %v4880_v13 = vld [vmem:[%s6216_s4 + $0x344] ss:$8 sps:$4 sm:$0xff]  }
 0x40d   : > { %2670 = vmatpush1.bf16.msra.mxu0 %v4866_v37  ;;  %4205 = vmatprep.mubr.msk.bf16.mxu0 %vm1915_vm8, %v2544_v39  ;;  %v4924_v37 = vld [vmem:[#allocation7 + $0xa0] ss:$8 sps:$4 sm:$0xff]   ;;  %v4927_v39 = vld [vmem:[#allocation7 + $0xb0] ss:$8 sps:$4 sm:$0xff]  }
 0x40e   : > { %2671 = vmatprep.subr.bf16.mxu0 %v4871_v38  ;;  %v4929_v38 = vld [vmem:[#allocation7 + $0xb4] ss:$8 sps:$4 sm:$0xff]  }
 0x411   : > { %2672 = vmatpush1.bf16.msra.mxu0 %v4869_v40  ;;  %v4932_v40 = vld [vmem:[#allocation7 + $0xc4] ss:$8 sps:$4 sm:$0xff]  }
 0x412   : > { %2673 = vmatprep.subr.bf16.mxu0 %v4874_v41  ;;  %v4930_v41 = vld [vmem:[#allocation7 + $0xc0] ss:$8 sps:$4 sm:$0xff]  }
 0x415   : > { %2674 = vmatpush1.bf16.msra.mxu0 %v4872_v2  ;;  %v4935_v2 = vld [vmem:[#allocation7 + $0xd4] ss:$8 sps:$4 sm:$0xff]  }
 0x416   : > { %2675 = vmatprep.subr.bf16.mxu0 %v4877_v8  ;;  %v4933_v8 = vld [vmem:[#allocation7 + $0xd0] ss:$8 sps:$4 sm:$0xff]  }
 0x419   : > { %2676 = vmatpush1.bf16.msra.mxu0 %v4875_v9  ;;  %v4938_v9 = vld [vmem:[#allocation7 + $0xe4] ss:$8 sps:$4 sm:$0xff]  }
 0x41a   : > { %2677 = vmatprep.subr.bf16.mxu0 %v4880_v13  ;;  %v4936_v13 = vld [vmem:[#allocation7 + $0xe0] ss:$8 sps:$4 sm:$0xff]  }
 0x41d   : > { %2678 = vmatpush1.bf16.msra.mxu0 %v4878_v42  ;;  %v4941_v42 = vld [vmem:[#allocation7 + $0xf4] ss:$8 sps:$4 sm:$0xff]  }
 0x41e   : > { %2679 = vmatprep.subr.bf16.mxu0 %v4883_v43  ;;  %v4939_v43 = vld [vmem:[#allocation7 + $0xf0] ss:$8 sps:$4 sm:$0xff]  }
 0x421   : > { %2680 = vmatpush1.bf16.msra.mxu0 %v4881_v44  ;;  %v4944_v44 = vld [vmem:[#allocation7 + $0x4] ss:$8 sps:$4 sm:$0xff]  }
 0x422   : > { %2681 = vmatprep.subr.bf16.mxu0 %v4886_v45  ;;  %v5014_v45 = vld [vmem:[%s6220_s8 + $0x40] sm:$0xff]  }
 0x425   : > { %2682 = vmatpush1.bf16.msra.mxu0 %v4884_v46  ;;  %v5015_v46 = vld [vmem:[%s6220_s8] sm:$0xff]  }
 0x426   : > { %2683 = vmatprep.subr.bf16.mxu0 %v4889_v47  ;;  %v5016_v47 = vld [vmem:[%s6220_s8 + $0x48] sm:$0xff]  }
 0x429   : > { %2684 = vmatpush1.bf16.msra.mxu0 %v4887_v48  ;;  %v5017_v48 = vld [vmem:[%s6220_s8 + $0x8] sm:$0xff]  }
 0x42a   : > { %2685 = vmatprep.subr.bf16.mxu0 %v4892_v49  ;;  %v5018_v49 = vld [vmem:[%s6220_s8 + $0x50] sm:$0xff]  }
 0x42d   : > { %2686 = vmatpush1.bf16.msra.mxu0 %v4890_v50  ;;  %v5019_v50 = vld [vmem:[%s6220_s8 + $0x10] sm:$0xff]  }
 0x42e   : > { %2687 = vmatprep.subr.bf16.mxu0 %v4895_v51  ;;  %v5020_v51 = vld [vmem:[%s6220_s8 + $0x58] sm:$0xff]  }
 0x431   : > { %2688 = vmatpush1.bf16.msra.mxu0 %v4893_v52  ;;  %v5021_v52 = vld [vmem:[%s6220_s8 + $0x18] sm:$0xff]  }
 0x432   : > { %2689 = vmatprep.subr.bf16.mxu0 %v4898_v53  ;;  %v5022_v53 = vld [vmem:[%s6220_s8 + $0x60] sm:$0xff]  }
 0x435   : > { %2690 = vmatpush1.bf16.msra.mxu0 %v4896_v54  ;;  %v5023_v54 = vld [vmem:[%s6220_s8 + $0x20] sm:$0xff]  }
 0x436   : > { %2691 = vmatprep.subr.bf16.mxu0 %v4901_v55  ;;  %v5024_v55 = vld [vmem:[%s6220_s8 + $0x68] sm:$0xff]  }
 0x439   : > { %2692 = vmatpush1.bf16.msra.mxu0 %v4899_v56  ;;  %v5025_v56 = vld [vmem:[%s6220_s8 + $0x28] sm:$0xff]  }
 0x43a   : > { %4358 = vmatprep.subr.bf16.mxu0 %v5014_v45  ;;  %v5007_v45 = vld [vmem:[#allocation7 + $0x1d4] ss:$8 sps:$4 sm:$0xff]  }
 0x43c   : > { %2702 = vmatmul.mubr.bf16.vlgmr.msra.gmra.mrb[8].mxu0 %v2543_v57  ;;  %v5026_v57 = vld [vmem:[%s6220_s8 + $0x70] sm:$0xff]  }
 0x43d   : > { %4359 = vmatpush3.bf16.msra.mxu0 %v5015_v46  ;;  %v5005_v46 = vld [vmem:[#allocation7 + $0x1d0] ss:$8 sps:$4 sm:$0xff]  }
 0x43e   : > { %4360 = vmatprep.subr.bf16.mxu0 %v5016_v47  ;;  %v5010_v47 = vld [vmem:[#allocation7 + $0x1e4] ss:$8 sps:$4 sm:$0xff]  }
 0x441   : > { %4361 = vmatpush3.bf16.msra.mxu0 %v5017_v48  ;;  %v5013_v48 = vld [vmem:[#allocation7 + $0x1f4] ss:$8 sps:$4 sm:$0xff]  }
 0x442   : > { %4362 = vmatprep.subr.bf16.mxu0 %v5018_v49  ;;  %v5011_v49 = vld [vmem:[#allocation7 + $0x1f0] ss:$8 sps:$4 sm:$0xff]  }
 0x445   : > { %4363 = vmatpush3.bf16.msra.mxu0 %v5019_v50 }
 0x446   : > { %4364 = vmatprep.subr.bf16.mxu0 %v5020_v51  ;;  %v5027_v51 = vld [vmem:[%s6220_s8 + $0x30] sm:$0xff]  }
 0x449   : > { %4365 = vmatpush3.bf16.msra.mxu0 %v5021_v52  ;;  %v5028_v52 = vld [vmem:[%s6220_s8 + $0x78] sm:$0xff]  }
 0x44a   : > { %4366 = vmatprep.subr.bf16.mxu0 %v5022_v53  ;;  %v5029_v53 = vld [vmem:[%s6220_s8 + $0x38] sm:$0xff]  }
 0x44d   : > { %4367 = vmatpush3.bf16.msra.mxu0 %v5023_v54  ;;  %v5030_v54 = vld [vmem:[%s6221_s9] sm:$0xff]  }
 0x44e   : > { %4368 = vmatprep.subr.bf16.mxu0 %v5024_v55  ;;  %v5031_v55 = vld [vmem:[%s6221_s9 + $0x8] sm:$0xff]  }
 0x451   : > { %4369 = vmatpush3.bf16.msra.mxu0 %v5025_v56 }
 0x452   : > { %4370 = vmatprep.subr.bf16.mxu0 %v5026_v57 }
 0x455   : > { %4371 = vmatpush3.bf16.msra.mxu0 %v5027_v51 }
 0x456   : > { %4372 = vmatprep.subr.bf16.mxu0 %v5028_v52 }
 0x459   : > { %4373 = vmatpush3.bf16.msra.mxu0 %v5029_v53 }
 0x50f   : > { %v2703_v58 = vpop.f32.mrb[8].mxu0 }
 0x510   : > { %v2712_v59 = vmax.f32 %v2703_v58, 0.0  ;;  %v2705_v60 = vpop.f32.mrb[9].mxu0 }
 0x511   : > { %v2713_v61 = vmax.f32 %v2705_v60, 0.0  ;;  %v2707_v62 = vpop.f32.mrb[10].mxu0 }
 0x512   : > { %v2714_v1 = vpack.c.bf16 %v2712_v59, %v2712_v59  ;;  %v2708_v3 = vpop.f32.mrb[11].mxu0 }
 0x513   : > { %v2715_v4 = vpack.c.bf16 %v2713_v61, %v2713_v61  ;;  %v4942_v3 = vld [vmem:[#allocation7] ss:$8 sps:$4 sm:$0xff]  }
 0x514   : > { %v2722_v6 = vsel %vm1256_vm5, %v2714_v1, 0 }
 0x515   : > { %4206 = vmatprep.subr.msk.bf16.mxu1 %vm1256_vm5, %v2715_v4 }
 0x516   : > { %2728 = vmatpush1.bf16.msra.mxu1 %v2722_v6  ;;  %v4945_v6 = vld [vmem:[#allocation7 + $0x10] ss:$8 sps:$4 sm:$0xff]  }
 0x517   : > { %4336 = vmatprep.subr.bf16.mxu1 %v4902_v5  ;;  %v4947_v5 = vld [vmem:[#allocation7 + $0x14] ss:$8 sps:$4 sm:$0xff]  }
 0x519   : > { %4207 = vmatmul.mubr.msk.bf16.vlgmr.msra.gmra.mrb[16].mxu1 %vm2717_vm9, %v2716_v63  ;;  %v4950_v63 = vld [vmem:[#allocation7 + $0x24] ss:$8 sps:$4 sm:$0xff]  }
 0x51a   : > { %4337 = vmatpush3.bf16.msra.mxu1 %v4903_v7  ;;  %v4948_v7 = vld [vmem:[#allocation7 + $0x20] ss:$8 sps:$4 sm:$0xff]  }
 0x51b   : > { %4338 = vmatprep.subr.bf16.mxu1 %v4904_v10  ;;  %v4953_v10 = vld [vmem:[#allocation7 + $0x34] ss:$8 sps:$4 sm:$0xff]  }
 0x51e   : > { %4339 = vmatpush3.bf16.msra.mxu1 %v4905_v14  ;;  %v4951_v14 = vld [vmem:[#allocation7 + $0x30] ss:$8 sps:$4 sm:$0xff]  }
 0x51f   : > { %4340 = vmatprep.subr.bf16.mxu1 %v4906_v15  ;;  %v4956_v15 = vld [vmem:[#allocation7 + $0x44] ss:$8 sps:$4 sm:$0xff]  }
 0x522   : > { %4341 = vmatpush3.bf16.msra.mxu1 %v4907_v17  ;;  %v4954_v17 = vld [vmem:[#allocation7 + $0x40] ss:$8 sps:$4 sm:$0xff]  }
 0x523   : > { %4342 = vmatprep.subr.bf16.mxu1 %v4908_v18  ;;  %v4959_v18 = vld [vmem:[#allocation7 + $0x54] ss:$8 sps:$4 sm:$0xff]  }
 0x526   : > { %4343 = vmatpush3.bf16.msra.mxu1 %v4909_v19  ;;  %v4957_v19 = vld [vmem:[#allocation7 + $0x50] ss:$8 sps:$4 sm:$0xff]  }
 0x527   : > { %4344 = vmatprep.subr.bf16.mxu1 %v4910_v11  ;;  %v4962_v11 = vld [vmem:[#allocation7 + $0x64] ss:$8 sps:$4 sm:$0xff]  }
 0x52a   : > { %4345 = vmatpush3.bf16.msra.mxu1 %v4911_v12  ;;  %v4960_v12 = vld [vmem:[#allocation7 + $0x60] ss:$8 sps:$4 sm:$0xff]  }
 0x52b   : > { %4346 = vmatprep.subr.bf16.mxu1 %v4912_v16  ;;  %v4965_v16 = vld [vmem:[#allocation7 + $0x74] ss:$8 sps:$4 sm:$0xff]  }
 0x52e   : > { %4347 = vmatpush3.bf16.msra.mxu1 %v4913_v20  ;;  %v4963_v20 = vld [vmem:[#allocation7 + $0x70] ss:$8 sps:$4 sm:$0xff]  }
 0x52f   : > { %4348 = vmatprep.subr.bf16.mxu1 %v4914_v21  ;;  %v4968_v21 = vld [vmem:[#allocation7 + $0x104] ss:$8 sps:$4 sm:$0xff]  }
 0x532   : > { %4349 = vmatpush3.bf16.msra.mxu1 %v4915_v22  ;;  %v4966_v22 = vld [vmem:[#allocation7 + $0x100] ss:$8 sps:$4 sm:$0xff]  }
 0x533   : > { %4350 = vmatprep.subr.bf16.mxu1 %v4916_v23  ;;  %v4971_v23 = vld [vmem:[#allocation7 + $0x114] ss:$8 sps:$4 sm:$0xff]  }
 0x536   : > { %4351 = vmatpush3.bf16.msra.mxu1 %v4917_v24  ;;  %v4969_v24 = vld [vmem:[#allocation7 + $0x110] ss:$8 sps:$4 sm:$0xff]  }
 0x537   : > { %3056 = vmatprep.subr.bf16.mxu1 %v4920_v25  ;;  %v4974_v25 = vld [vmem:[#allocation7 + $0x124] ss:$8 sps:$4 sm:$0xff]  }
 0x5ec   : > { %v2761_v26 = vpop.f32.mrb[16].mxu1 }
 0x5ed   : > { %v2763_v27 = vpop.f32.mrb[17].mxu1  ;;  %v2768_v31 = vpack.c.bf16 %v2761_v26, %v2761_v26  ;;  %v4972_v26 = vld [vmem:[#allocation7 + $0x120] ss:$8 sps:$4 sm:$0xff]  }
 0x5ee   : > { %v2769_v28 = vpack.c.bf16 %v2763_v27, %v2763_v27  ;;  %v2765_v29 = vpop.f32.mrb[18].mxu1  ;;  %v4977_v27 = vld [vmem:[#allocation7 + $0x134] ss:$8 sps:$4 sm:$0xff]  }
 0x5ef   : > { %v2766_v32 = vpop.f32.mrb[19].mxu1  ;;  %v4980_v29 = vld [vmem:[#allocation7 + $0x144] ss:$8 sps:$4 sm:$0xff]  }
 0x5f0   : > { %2930 = vmatprep.mubr.bf16.mxu1 %v2769_v28  ;;  %v4975_v28 = vld [vmem:[#allocation7 + $0x130] ss:$8 sps:$4 sm:$0xff]  }
 0x5f1   : > { %2931 = vmatmul.mubr.bf16.vlgmr.msra.gmra.mrb[20].mxu1 %v2768_v31  ;;  %v4983_v31 = vld [vmem:[#allocation7 + $0x154] ss:$8 sps:$4 sm:$0xff]   ;;  %v4981_v32 = vld [vmem:[#allocation7 + $0x150] ss:$8 sps:$4 sm:$0xff]  }
 0x5f2   : > { %3057 = vmatpush1.bf16.msra.mxu1 %v4918_v30  ;;  %3088 = vmatprep.mubr.bf16.mxu1 %v5203_v0  ;;  %v4978_v30 = vld [vmem:[#allocation7 + $0x140] ss:$8 sps:$4 sm:$0xff]  }
 0x5f3   : > { %3058 = vmatprep.subr.bf16.mxu1 %v4923_v33  ;;  %v4986_v33 = vld [vmem:[#allocation7 + $0x164] ss:$8 sps:$4 sm:$0xff]  }
 0x5f6   : > { %3059 = vmatpush1.bf16.msra.mxu1 %v4921_v34  ;;  %v4984_v34 = vld [vmem:[#allocation7 + $0x160] ss:$8 sps:$4 sm:$0xff]  }
 0x5f7   : > { %3060 = vmatprep.subr.bf16.mxu1 %v4926_v36  ;;  %v4989_v36 = vld [vmem:[#allocation7 + $0x174] ss:$8 sps:$4 sm:$0xff]  }
 0x5fa   : > { %3061 = vmatpush1.bf16.msra.mxu1 %v4924_v37  ;;  %v4987_v37 = vld [vmem:[#allocation7 + $0x170] ss:$8 sps:$4 sm:$0xff]  }
 0x5fb   : > { %3062 = vmatprep.subr.bf16.mxu1 %v4929_v38  ;;  %v4992_v38 = vld [vmem:[#allocation7 + $0x184] ss:$8 sps:$4 sm:$0xff]  }
 0x5fe   : > { %3063 = vmatpush1.bf16.msra.mxu1 %v4927_v39  ;;  %v4990_v39 = vld [vmem:[#allocation7 + $0x180] ss:$8 sps:$4 sm:$0xff]  }
 0x5ff   : > { %3064 = vmatprep.subr.bf16.mxu1 %v4932_v40 }
 0x602   : > { %3065 = vmatpush1.bf16.msra.mxu1 %v4930_v41  ;;  %v4995_v41 = vld [vmem:[#allocation7 + $0x194] ss:$8 sps:$4 sm:$0xff]  }
 0x603   : > { %3066 = vmatprep.subr.bf16.mxu1 %v4935_v2  ;;  %v4993_v2 = vld [vmem:[#allocation7 + $0x190] ss:$8 sps:$4 sm:$0xff]  }
 0x606   : > { %3067 = vmatpush1.bf16.msra.mxu1 %v4933_v8  ;;  %v4998_v8 = vld [vmem:[#allocation7 + $0x1a4] ss:$8 sps:$4 sm:$0xff]  }
 0x607   : > { %3068 = vmatprep.subr.bf16.mxu1 %v4938_v9  ;;  %v4996_v9 = vld [vmem:[#allocation7 + $0x1a0] ss:$8 sps:$4 sm:$0xff]  }
 0x60a   : > { %3069 = vmatpush1.bf16.msra.mxu1 %v4936_v13  ;;  %v5001_v13 = vld [vmem:[#allocation7 + $0x1b4] ss:$8 sps:$4 sm:$0xff]  }
 0x60b   : > { %3070 = vmatprep.subr.bf16.mxu1 %v4941_v42  ;;  %v4999_v42 = vld [vmem:[#allocation7 + $0x1b0] ss:$8 sps:$4 sm:$0xff]  }
 0x60e   : > { %3071 = vmatpush1.bf16.msra.mxu1 %v4939_v43  ;;  %v5004_v43 = vld [vmem:[#allocation7 + $0x1c4] ss:$8 sps:$4 sm:$0xff]  }
 0x60f   : > { %3177 = vmatprep.subr.bf16.mxu1 %v4944_v44  ;;  %v5002_v44 = vld [vmem:[#allocation7 + $0x1c0] ss:$8 sps:$4 sm:$0xff]  }
 0x6c4   : > { %v4352_v58 = vpop.f32.mrb[20].mxu1 }
 0x6c5   : > { %v4353_v59 = vpop.f32.mrb[21].mxu1 }
 0x6c6   : > { %v4354_v60 = vadd.f32 %v4353_v59, %v4352_v58  ;;  %v4355_v61 = vpop.f32.mrb[22].mxu1 }
 0x6c7   : > { %v4356_v62 = vpop.f32.mrb[23].mxu1 }
 0x6c8   : > { %v6122_v1 = vpack.c.bf16 %v4354_v60, %v4354_v60 }
 0x6ca   : > { %v2973_v4 = vshrl.u32 %v6122_v1, 16  ;;  %v3236_v40 = vrot.slane %v6122_v1, 1 }
 0x6cc   : > { %3089 = vmatmul.mubr.bf16.vlgmr.msra.gmra.mrb[24].mxu1 %v2973_v4  ;;  %v3378_v50 = vrot.slane %v2973_v4, 1  ;;  %v5033_v4 = vld [vmem:[%s6221_s9 + $0x18] sm:$0xff]  }
 0x6cd   : > { %3178 = vmatpush1.bf16.msra.mxu1 %v4942_v3  ;;  %3209 = vmatprep.mubr.bf16.mxu1 %v5203_v0  ;;  %v5032_v3 = vld [vmem:[%s6221_s9 + $0x10] sm:$0xff]  }
 0x6ce   : > { %3179 = vmatprep.subr.bf16.mxu1 %v4947_v5 }
 0x6d1   : > { %3180 = vmatpush1.bf16.msra.mxu1 %v4945_v6 }
 0x6d2   : > { %3181 = vmatprep.subr.bf16.mxu1 %v4950_v63 }
 0x6d5   : > { %3182 = vmatpush1.bf16.msra.mxu1 %v4948_v7 }
 0x6d6   : > { %3183 = vmatprep.subr.bf16.mxu1 %v4953_v10 }
 0x6d9   : > { %3184 = vmatpush1.bf16.msra.mxu1 %v4951_v14 }
 0x6da   : > { %3185 = vmatprep.subr.bf16.mxu1 %v4956_v15 }
 0x6dd   : > { %3186 = vmatpush1.bf16.msra.mxu1 %v4954_v17 }
 0x6de   : > { %3187 = vmatprep.subr.bf16.mxu1 %v4959_v18 }
 0x6e1   : > { %3188 = vmatpush1.bf16.msra.mxu1 %v4957_v19 }
 0x6e2   : > { %3189 = vmatprep.subr.bf16.mxu1 %v4962_v11 }
 0x6e5   : > { %3190 = vmatpush1.bf16.msra.mxu1 %v4960_v12 }
 0x6e6   : > { %3191 = vmatprep.subr.bf16.mxu1 %v4965_v16 }
 0x6e9   : > { %3192 = vmatpush1.bf16.msra.mxu1 %v4963_v20 }
 0x6ea   : > { %3318 = vmatprep.subr.bf16.mxu1 %v4968_v21 }
 0x6ec   : > { %3210 = vmatmul.mubr.bf16.vlgmr.msra.gmra.mrb[24].mxu1 %v6122_v1 }
 0x6ed   : > { %3319 = vmatpush1.bf16.msra.mxu1 %v4966_v22  ;;  %3350 = vmatprep.mubr.bf16.mxu1 %v5203_v0 }
 0x6ee   : > { %3320 = vmatprep.subr.bf16.mxu1 %v4971_v23 }
 0x6f1   : > { %3321 = vmatpush1.bf16.msra.mxu1 %v4969_v24 }
 0x6f2   : > { %3322 = vmatprep.subr.bf16.mxu1 %v4974_v25 }
 0x6f5   : > { %3323 = vmatpush1.bf16.msra.mxu1 %v4972_v26 }
 0x6f6   : > { %3324 = vmatprep.subr.bf16.mxu1 %v4977_v27 }
 0x6f9   : > { %3325 = vmatpush1.bf16.msra.mxu1 %v4975_v28 }
 0x6fa   : > { %3326 = vmatprep.subr.bf16.mxu1 %v4980_v29 }
 0x6fd   : > { %3327 = vmatpush1.bf16.msra.mxu1 %v4978_v30 }
 0x6fe   : > { %3328 = vmatprep.subr.bf16.mxu1 %v4983_v31 }
 0x701   : > { %3329 = vmatpush1.bf16.msra.mxu1 %v4981_v32 }
 0x702   : > { %3330 = vmatprep.subr.bf16.mxu1 %v4986_v33 }
 0x705   : > { %3331 = vmatpush1.bf16.msra.mxu1 %v4984_v34 }
 0x706   : > { %3332 = vmatprep.subr.bf16.mxu1 %v4989_v36 }
 0x709   : > { %3333 = vmatpush1.bf16.msra.mxu1 %v4987_v37 }
 0x70a   : > { %3460 = vmatprep.subr.bf16.mxu1 %v4992_v38 }
 0x70c   : > { %3351 = vmatmul.mubr.bf16.vlgmr.msra.gmra.mrb[24].mxu1 %v3236_v40 }
 0x70d   : > { %3461 = vmatpush1.bf16.msra.mxu1 %v4990_v39  ;;  %3492 = vmatprep.mubr.bf16.mxu1 %v5203_v0  ;;  %v5008_v0 = vld [vmem:[#allocation7 + $0x1e0] ss:$8 sps:$4 sm:$0xff]  }
 0x70e   : > { %3462 = vmatprep.subr.bf16.mxu1 %v4995_v41 }
 0x711   : > { %3463 = vmatpush1.bf16.msra.mxu1 %v4993_v2 }
 0x712   : > { %3464 = vmatprep.subr.bf16.mxu1 %v4998_v8 }
 0x715   : > { %3465 = vmatpush1.bf16.msra.mxu1 %v4996_v9 }
 0x716   : > { %3466 = vmatprep.subr.bf16.mxu1 %v5001_v13 }
 0x719   : > { %3467 = vmatpush1.bf16.msra.mxu1 %v4999_v42 }
 0x71a   : > { %3468 = vmatprep.subr.bf16.mxu1 %v5004_v43 }
 0x71d   : > { %3469 = vmatpush1.bf16.msra.mxu1 %v5002_v44 }
 0x71e   : > { %3470 = vmatprep.subr.bf16.mxu1 %v5007_v45 }
 0x721   : > { %3471 = vmatpush1.bf16.msra.mxu1 %v5005_v46 }
 0x722   : > { %3472 = vmatprep.subr.bf16.mxu1 %v5010_v47 }
 0x725   : > { %3473 = vmatpush1.bf16.msra.mxu1 %v5008_v0 }
 0x726   : > { %3474 = vmatprep.subr.bf16.mxu1 %v5013_v48 }
 0x729   : > { %3475 = vmatpush1.bf16.msra.mxu1 %v5011_v49 }
 0x72a   : > { %4433 = vmatprep.subr.bf16.mxu1 %v5204_v35 }
 0x72c   : > { %3493 = vmatmul.mubr.bf16.vlgmr.msra.gmra.mrb[24].mxu1 %v3378_v50 }
 0x72d   : > { %4441 = vmatprep.mubr.msk.bf16.mxu1 %vm5205_vm7, %v5204_v35  ;;  %4434 = vmatpush3.bf16.msra.mxu1 %v5030_v54 }
 0x72e   : > { %4435 = vmatprep.subr.bf16.mxu1 %v5204_v35 }
 0x731   : > { %4436 = vmatpush3.bf16.msra.mxu1 %v5031_v55 }
 0x732   : > { %4437 = vmatprep.subr.bf16.mxu1 %v5204_v35 }
 0x735   : > { %4438 = vmatpush3.bf16.msra.mxu1 %v5032_v3 }
 0x736   : > { %4439 = vmatprep.subr.bf16.mxu1 %v5204_v35 }
 0x739   : > { %4440 = vmatpush3.bf16.msra.mxu1 %v5033_v4 }
 0x7ff   : > { %v3494_v56 = vpop.f32.mrb[24].mxu1 }
 0x800   : > { %v3503_v57 = vmax.f32 %v3494_v56, 0.0  ;;  %v3496_v58 = vpop.f32.mrb[25].mxu1 }
 0x801   : > { %v3504_v59 = vmax.f32 %v3496_v58, 0.0  ;;  %v3498_v60 = vpop.f32.mrb[26].mxu1 }
 0x802   : > { %v3499_v61 = vpop.f32.mrb[27].mxu1  ;;  %v3505_v1 = vpack.c.bf16 %v3503_v57, %v3503_v57 }
 0x803   : > { %v3506_v62 = vpack.c.bf16 %v3504_v59, %v3504_v59 }
 0x805   : > { %3667 = vmatprep.mubr.bf16.mxu0 %v3506_v62 }
 0x806   : > { %3668 = vmatmul.mubr.bf16.vlgmr.msra.gmra.mrb[12].mxu0 %v3505_v1 }
 0x8d9   : > { %v4374_v5 = vpop.f32.mrb[12].mxu0 }
 0x8da   : > { %v4375_v6 = vpop.f32.mrb[13].mxu0 }
 0x8db   : > { %v4376_v63 = vadd.f32 %v4375_v6, %v4374_v5  ;;  %v4377_v7 = vpop.f32.mrb[14].mxu0 }
 0x8dc   : > { %v4378_v10 = vpop.f32.mrb[15].mxu0 }
 0x8dd   : > { %v3675_v14 = vmax.f32 %v4376_v63, 0.0 }
 0x8df   : > { %v3676_v15 = vpack.c.bf16 %v3675_v14, %v3675_v14 }
 0x8e1   : > { %4442 = vmatmul.mubr.msk.bf16.vlgmr.msra.gmra.mrb[28].mxu1 %vm1915_vm8, %v3676_v15 }
 0x9b4   : > { %v3746_v17 = vpop.f32.mrb[28].mxu1 }
 0x9b5   : > { %v4443_v18 = vpop.f32.mrb[29].mxu1  ;;  %v3753_v35 = vsel %vm3752_vm10, %v3746_v17, -inf }
 0x9b6   : > { %3754 = vmax.xlane.f32.xlu0 %v3753_v35  ;;  %v3749_v19 = vpop.f32.mrb[30].mxu1 }
 0x9b7   : > { %v4444_v11 = vpop.f32.mrb[31].mxu1 }
 0xa43   : > { %v3755_v12 = vpop.xlane.xlu0 %3754 }
 0xa44   : > { %v3756_v16 = vsub.f32 %v3746_v17, %v3755_v12 }
 0xa46   : > { %v3757_v20 = vmul.f32 1.442695, %v3756_v16 }
 0xa48   : > { %5034 = vpow2.f32 %v3757_v20 }
 0xa52   : > { %v5035_v21 = vpop.eup %5034 }
 0xa53   : > { %v3759_v22 = vsel %vm3752_vm10, %v5035_v21, 0.0 }
 0xa54   : > { %3760 = vadd.xlane.f32.xlu0 %v3759_v22 }
 0xae1   : > { %v3761_v23 = vpop.xlane.xlu0 %3760 }
 0xae2   : > { %5036 = vlog2.f32 %v3761_v23 }
 0xaec   : > { %v5037_v24 = vpop.eup %5036 }
 0xaed   : > { %v3763_v25 = vmul.f32 0.6931472, %v5037_v24 }
 0xaef   : > { %v3764_v26 = vadd.f32 %v3763_v25, %v3755_v12 }
 0xaf1   : > { %v3765_v27 = vsub.f32 %v3746_v17, %v3764_v26 }
 0xaf3   : > { %3766 = vst.msk [vmem:[%s395_s29] sm:$0x1] %vm3752_vm10, %v3765_v27 }
 0xaf4   : > { %5135 = shalt.err (!%p5132_p11)
}
 0xaf5   : > { %s5136_s28 = scalar_lea.hbm %s6169_s19, 16  ;;  %s5140_s12 = scalar_lea.hbm %s6222_s10, 32 }
 0xaf6   : > { %p5137_p13 = scmp.ne.s32.totalorder %s6169_s19, %s5136_s28  ;;  %p5141_p6 = scmp.lt.u32.totalorder %s6169_s19, %s6222_s10 }
 0xaf7   : > { %p5142_p9 = scmp.lt.u32.totalorder %s5140_s12, %s5136_s28  ;;  %p5144_p12 = scmp.lt.u32.totalorder %s5136_s28, %s6169_s19 }
 0xaf8   : > { %p5138_p5 = pnand %p5137_p13, %p6248_p1 }
 0xaf9   : > { %p5143_p10 = por %p5142_p9, %p5141_p6 }
 0xafa   : > { %p5139_p0 = pneg %p5138_p5 }
 0xafb   : > { %p5145_p2 = por %p5144_p12, %p5143_p10 }
 0xafd   : > { %p5146_p3 = pnand %p5145_p2, %p5139_p0 }
 0xaff   : > { %5149 = shalt.err (!%p5146_p3)
}
 0xb00   : > { %4542 = dma.vmem_to_hbm [thread:$0]  (%p6248_p1), %s6171_s11, 16, %s6169_s19, %s3768_s13  }
 0xb01 PF: > { %s6249_s18 = sld [smem:[#allocation12_spill]]  ;;  %s6250_s21 = sld [smem:[#allocation16_spill]] }
 0xb02   : > { %p4564_p4 = scmp.ge.s32.totalorder %s5192_s16, 2 }
 0xb07   : > { %s3792_s29 = sand.u32 1, %s6249_s18   ;;  %p6251_p7 = scmp.ne.s32.totalorder %s6250_s21, 0 }
 0xb08   : > { %s3793_s27 = scalar_lea.sflag [#allocation4], %s3792_s29 }
 0xb09   : > { %p4555_p8 = pnand %p4564_p4, %p6251_p7 }
 0xb0b   : > { %5175 = dma.done.wait (!%p4555_p8), %s3793_s27, 16  }
 0xb0c   : > { %5177 = vsyncadd (!%p4555_p8), %s3793_s27, 4294967280  ;;  %s6252_s16 = sld [smem:[#allocation14_spill]]  ;;  %s6253_s30 = sld [smem:[#allocation13_spill]] }
 0xb0d   : > { %s6254_s15 = sld [smem:[#allocation15_spill]]  ;;  %s6255_s13 = smov %s5184_s14 }
 0xb12   : > { %p22_p11 = scmp.ge.s32.totalorder %s6252_s16, 4   ;;  %s6256_s14 = smov %s6253_s30 }
 0xb14   :  { %24 = sbr.rel (!%p22_p11) target bundleno = 7 (0x7), region = 119 }
 0xb1b   :  { %3797 = vsyncpa [#allocation3], 1 }
 0xb1c   :  { %3799 = vsyncpa [#allocation3 + $0x1], 1 }
 0xb1d   :  { %3800 = vsyncpa [#allocation6], 1 }
 0xb1e   :  { %3801 = vsyncpa [#allocation4], 1 }
 0xb1f   :  { %3803 = vsyncpa [#allocation4 + $0x1], 1 }

</bundles_post_ra>
